<compile_context>
chip_gen: v7x
topology: tpu7x:2x2x1
jax: 0.10.0
libtpu: 0.0.40
codegen_flags: <defaults>
</compile_context>

<pallas_src>
import functools

import jax
import jax.numpy as jnp
from jax.experimental import pallas as pl
from jax.experimental.pallas import tpu as pltpu

LANE = 128     # lane width  (last-dim alignment)
SUBLANE = 8    # sublane width (second-to-last-dim alignment)


def _round_up(x, m):
    return (x + m - 1) // m * m


def lstm_block_kernel(x_ref, h0_ref, c0_ref, w_ref, b_ref,
                      hn_ref, cn_ref, h_scr, c_scr,
                      *, t_blk, t_total, hp, needs_mask, unroll):
    """Grid = (batch_blocks, time_blocks); each invocation runs t_blk steps."""
    t_idx = pl.program_id(1)
    b_blk = h_scr.shape[0]

    # (Re)initialize the recurrent state at the start of each batch block.
    @pl.when(t_idx == 0)
    def _():
        h_scr[...] = h0_ref[0].astype(jnp.float32)
        c_scr[...] = c0_ref[0].astype(jnp.float32)

    # --- loop-invariant hoists (weights, bias broadcast, base time index) ---
    w = w_ref[...]                                          # (2Hp, 4Hp) fused
    bias = jnp.broadcast_to(b_ref[...], (b_blk, 4 * hp))    # (B_BLK, 4Hp)
    t_base = t_idx * t_blk

    def step(i, carry):
        h, c = carry
        x_t = x_ref[i].astype(jnp.float32)                  # (B_BLK, Hp)
        xh = jnp.concatenate([x_t, h], axis=-1)             # (B_BLK, 2Hp)
        # One fused MXU matmul per timestep: (B,2Hp) @ (2Hp,4Hp)
        gates = jnp.dot(xh, w, preferred_element_type=jnp.float32) + bias
        # PyTorch gate ordering: i, f, g, o — each slice is a full 128-lane tile.
        i_g = jax.nn.sigmoid(gates[:, 0 * hp:1 * hp])
        f_g = jax.nn.sigmoid(gates[:, 1 * hp:2 * hp])
        g_g = jnp.tanh(gates[:, 2 * hp:3 * hp])
        o_g = jax.nn.sigmoid(gates[:, 3 * hp:4 * hp])
        c_new = f_g * c + i_g * g_g
        h_new = o_g * jnp.tanh(c_new)
        if needs_mask:  # only emitted when T does not divide evenly into blocks
            valid = (t_base + i) < t_total
            h_new = jnp.where(valid, h_new, h)
            c_new = jnp.where(valid, c_new, c)
        return h_new, c_new

    h_fin, c_fin = jax.lax.fori_loop(
        0, t_blk, step, (h_scr[...], c_scr[...]), unroll=unroll)

    h_scr[...] = h_fin
    c_scr[...] = c_fin

    @pl.when(t_idx == pl.num_programs(1) - 1)
    def _():
        hn_ref[0] = h_fin.astype(hn_ref.dtype)
        cn_ref[0] = c_fin.astype(cn_ref.dtype)


def _pad_gates_mat(w, h, hp):
    """(4H, H) PyTorch gate-stacked weight -> (4Hp, Hp), zero-padded per gate."""
    w4 = w.reshape(4, h, h)
    out = jnp.zeros((4, hp, hp), w.dtype)
    out = out.at[:, :h, :h].set(w4)
    return out.reshape(4 * hp, hp)


def _pad_gates_vec(b, h, hp):
    b4 = b.reshape(4, h)
    out = jnp.zeros((4, hp), b.dtype)
    out = out.at[:, :h].set(b4)
    return out.reshape(4 * hp)


@jax.jit
def lstm_pallas(x_emb, h0, c0, w_ih, w_hh, b_ih, b_hh):
    """x_emb: (T, B, H); h0/c0: (1, B, H); weights in PyTorch LSTM layout."""
    T, B, H = x_emb.shape
    f32 = jnp.float32

    Hp = _round_up(H, LANE)        # lane-align hidden dim (gate slices = vregs)
    Bp = _round_up(B, SUBLANE)     # sublane-align batch
    t_blk = min(T, 32)             # timesteps per grid step (multi-KiB x DMA)
    T_pad = _round_up(T, t_blk)
    b_blk = min(Bp, 128)
    Bp = _round_up(Bp, b_blk)
    nb, nt = Bp // b_blk, T_pad // t_blk
    needs_mask = (T_pad != T)

    # Fused weight: rows [W_ih^T ; W_hh^T] -> (2Hp, 4Hp); bias pre-summed.
    # NOTE: weights are grid-invariant (constant index_map), so they are DMA'd
    # once and re-used.  TODO(synk): for realistic H (~1024) on v7x, store the
    # fused weight in bf16 and raise vmem_limit_bytes to avoid VMEM pressure.
    w_cat = jnp.concatenate(
        [_pad_gates_mat(w_ih.astype(f32), H, Hp).T,
         _pad_gates_mat(w_hh.astype(f32), H, Hp).T], axis=0)
    bias = _pad_gates_vec((b_ih + b_hh).astype(f32), H, Hp).reshape(1, 4 * Hp)

    x_p = jnp.zeros((T_pad, Bp, Hp), f32).at[:T, :B, :H].set(x_emb.astype(f32))
    h0_p = jnp.zeros((1, Bp, Hp), f32).at[:, :B, :H].set(h0.astype(f32))
    c0_p = jnp.zeros((1, Bp, Hp), f32).at[:, :B, :H].set(c0.astype(f32))

    kernel = functools.partial(
        lstm_block_kernel, t_blk=t_blk, t_total=T, hp=Hp,
        needs_mask=needs_mask, unroll=min(t_blk, 8))

    grid_spec = pltpu.PrefetchScalarGridSpec(
        num_scalar_prefetch=0,
        grid=(nb, nt),
        in_specs=[
            pl.BlockSpec((t_blk, b_blk, Hp), lambda b, t: (t, b, 0)),  # x block
            pl.BlockSpec((1, b_blk, Hp), lambda b, t: (0, b, 0)),      # h0
            pl.BlockSpec((1, b_blk, Hp), lambda b, t: (0, b, 0)),      # c0
            pl.BlockSpec((2 * Hp, 4 * Hp), lambda b, t: (0, 0)),       # fused W
            pl.BlockSpec((1, 4 * Hp), lambda b, t: (0, 0)),            # bias
        ],
        out_specs=[
            pl.BlockSpec((1, b_blk, Hp), lambda b, t: (0, b, 0)),      # h_n
            pl.BlockSpec((1, b_blk, Hp), lambda b, t: (0, b, 0)),      # c_n
        ],
        scratch_shapes=[
            pltpu.VMEM((b_blk, Hp), jnp.float32),   # h state (carries across t)
            pltpu.VMEM((b_blk, Hp), jnp.float32),   # c state
        ],
    )

    hn_p, cn_p = pl.pallas_call(
        kernel,
        out_shape=(
            jax.ShapeDtypeStruct((1, Bp, Hp), x_emb.dtype),
            jax.ShapeDtypeStruct((1, Bp, Hp), x_emb.dtype),
        ),
        grid_spec=grid_spec,
        compiler_params=pltpu.CompilerParams(
            # batch is the only parallel dim (v7x 2-TC); time is a recurrence.
            dimension_semantics=("parallel", "arbitrary"),
        ),
    )(x_p, h0_p, c0_p, w_cat, bias)

    return hn_p[:, :B, :H], cn_p[:, :B, :H]


def encoder_rnn_cell_forward(tokens, hidden, params):
    """Mirrors EncoderRNNCell.forward: embed -> LSTM -> return (h_n, c_n)."""
    # TODO(synk): the embedding lookup is a data-dependent gather (cheap glue)
    # done in plain JAX; it has no clean rectangular-BlockSpec expression.
    emb = params["embedding"]                       # (vocab, H), row 0 == 0
    x_emb = jnp.take(emb, tokens, axis=0)           # (T, B, H)
    h0, c0 = hidden
    return lstm_pallas(x_emb, h0, c0,
                       params["w_ih"], params["w_hh"],
                       params["b_ih"], params["b_hh"])


# ----------------------- pure-JAX reference (for checking) -----------------
def lstm_ref(x_emb, h0, c0, w_ih, w_hh, b_ih, b_hh):
    def step(carry, x_t):
        h, c = carry
        gates = x_t @ w_ih.T + b_ih + h @ w_hh.T + b_hh
        i, f, g, o = jnp.split(gates, 4, axis=-1)
        i, f, o = jax.nn.sigmoid(i), jax.nn.sigmoid(f), jax.nn.sigmoid(o)
        g = jnp.tanh(g)
        c = f * c + i * g
        h = o * jnp.tanh(c)
        return (h, c), h

    (h, c), _ = jax.lax.scan(step, (h0[0], c0[0]), x_emb)
    return h[None], c[None]


if __name__ == "__main__":
    # Small shapes consistent with the module:
    #   output_size (vocab) = 16, hidden_size = input_size = 32,
    #   seq_len = 8, batch = 4
    VOCAB, H, T, B = 16, 32, 8, 4

    key = jax.random.PRNGKey(0)
    k_emb, k_wih, k_whh, k_bih, k_bhh, k_tok = jax.random.split(key, 6)

    bound = 1.0 / jnp.sqrt(jnp.float32(H))
    embedding = jax.random.normal(k_emb, (VOCAB, H), jnp.float32)
    embedding = embedding.at[0].set(0.0)            # padding_idx=0
    w_ih = jax.random.uniform(k_wih, (4 * H, H), jnp.float32, -bound, bound)
    w_hh = jax.random.uniform(k_whh, (4 * H, H), jnp.float32, -bound, bound)
    b_ih = jax.random.uniform(k_bih, (4 * H,), jnp.float32, -bound, bound)
    b_hh = jax.random.uniform(k_bhh, (4 * H,), jnp.float32, -bound, bound)

    params = dict(embedding=embedding, w_ih=w_ih, w_hh=w_hh,
                  b_ih=b_ih, b_hh=b_hh)

    tokens = jax.random.randint(k_tok, (T, B), 0, VOCAB, jnp.int32)
    h0 = jnp.zeros((1, B, H), jnp.float32)          # initHidden(batch)
    c0 = jnp.zeros((1, B, H), jnp.float32)
    # TODO(synk): initHidden only returns h0; PyTorch's LSTM needs the (h0, c0)
    # tuple, so we pass the natural zero-initialized tuple here.

    hn, cn = encoder_rnn_cell_forward(tokens, (h0, c0), params)
    hn, cn = jax.block_until_ready((hn, cn))

    x_emb = jnp.take(embedding, tokens, axis=0)
    hn_ref, cn_ref = lstm_ref(x_emb, h0, c0, w_ih, w_hh, b_ih, b_hh)

    assert hn.shape == (1, B, H) and cn.shape == (1, B, H)
    assert jnp.allclose(hn, hn_ref, atol=1e-5, rtol=1e-5)
    assert jnp.allclose(cn, cn_ref, atol=1e-5, rtol=1e-5)
    print("KERNEL_OK")
</pallas_src>

<mosaic_0001>
module attributes {stable_mosaic.version = 11 : i64} {
  func.func @lstm_block_kernel(%arg0: i32, %arg1: i32, %arg2: memref<8x8x128xf32, #tpu.memory_space<vmem>>, %arg3: memref<1x8x128xf32, #tpu.memory_space<vmem>>, %arg4: memref<1x8x128xf32, #tpu.memory_space<vmem>>, %arg5: memref<256x512xf32, #tpu.memory_space<vmem>>, %arg6: memref<1x512xf32, #tpu.memory_space<vmem>>, %arg7: memref<1x8x128xf32, #tpu.memory_space<vmem>>, %arg8: memref<1x8x128xf32, #tpu.memory_space<vmem>>, %arg9: memref<8x128xf32, #tpu.memory_space<vmem>>, %arg10: memref<8x128xf32, #tpu.memory_space<vmem>>) attributes {dimension_semantics = [#tpu.dimension_semantics<parallel>, #tpu.dimension_semantics<arbitrary>], iteration_bounds = array<i64: 1, 1>, scalar_prefetch = 0 : i64, scratch_operands = 2 : i64, tpu.core_type = #tpu.core_type<tc>, window_params = [{transform_indices = @transform_0, window_bounds = array<i64: 8, 8, 128>}, {transform_indices = @transform_1, window_bounds = array<i64: 1, 8, 128>}, {transform_indices = @transform_2, window_bounds = array<i64: 1, 8, 128>}, {pipeline_mode = #tpu.pipeline_mode<synchronous>, transform_indices = @transform_3, window_bounds = array<i64: 256, 512>}, {pipeline_mode = #tpu.pipeline_mode<synchronous>, transform_indices = @transform_4, window_bounds = array<i64: 1, 512>}, {transform_indices = @transform_5, window_bounds = array<i64: 1, 8, 128>}, {transform_indices = @transform_6, window_bounds = array<i64: 1, 8, 128>}]} {
    %c0_i32 = arith.constant 0 : i32
    %0 = arith.cmpi eq, %arg1, %c0_i32 : i32
    %1 = arith.extui %0 : i1 to i32
    %c0_i32_0 = arith.constant 0 : i32
    %2 = arith.cmpi ne, %1, %c0_i32_0 : i32
    scf.if %2 {
      %c0_62 = arith.constant 0 : index
      %c0_63 = arith.constant 0 : index
      %c0_64 = arith.constant 0 : index
      %262 = vector.load %arg3[%c0_62, %c0_63, %c0_64] : memref<1x8x128xf32, #tpu.memory_space<vmem>>, vector<1x8x128xf32>
      %263 = vector.shape_cast %262 : vector<1x8x128xf32> to vector<8x128xf32>
      %c0_65 = arith.constant 0 : index
      %c0_66 = arith.constant 0 : index
      %264 = vector.load %arg9[%c0_65, %c0_66] : memref<8x128xf32, #tpu.memory_space<vmem>>, vector<8x128xf32>
      tpu.vector_store %arg9[%c0_65, %c0_66], %263 {strides = array<i32>} : memref<8x128xf32, #tpu.memory_space<vmem>>, vector<8x128xf32>,
      %c0_67 = arith.constant 0 : index
      %c0_68 = arith.constant 0 : index
      %c0_69 = arith.constant 0 : index
      %265 = vector.load %arg4[%c0_67, %c0_68, %c0_69] : memref<1x8x128xf32, #tpu.memory_space<vmem>>, vector<1x8x128xf32>
      %266 = vector.shape_cast %265 : vector<1x8x128xf32> to vector<8x128xf32>
      %c0_70 = arith.constant 0 : index
      %c0_71 = arith.constant 0 : index
      %267 = vector.load %arg10[%c0_70, %c0_71] : memref<8x128xf32, #tpu.memory_space<vmem>>, vector<8x128xf32>
      tpu.vector_store %arg10[%c0_70, %c0_71], %266 {strides = array<i32>} : memref<8x128xf32, #tpu.memory_space<vmem>>, vector<8x128xf32>,
    } else {
    }
    %c0 = arith.constant 0 : index
    %c0_1 = arith.constant 0 : index
    %3 = vector.load %arg5[%c0, %c0_1] : memref<256x512xf32, #tpu.memory_space<vmem>>, vector<256x512xf32>
    %c0_2 = arith.constant 0 : index
    %c0_3 = arith.constant 0 : index
    %4 = vector.load %arg6[%c0_2, %c0_3] : memref<1x512xf32, #tpu.memory_space<vmem>>, vector<1x512xf32>
    %5 = vector.shape_cast %4 : vector<1x512xf32> to vector<1x512xf32>
    %6 = vector.broadcast %5 : vector<1x512xf32> to vector<8x512xf32>
    %c0_4 = arith.constant 0 : index
    %c0_5 = arith.constant 0 : index
    %7 = vector.load %arg9[%c0_4, %c0_5] : memref<8x128xf32, #tpu.memory_space<vmem>>, vector<8x128xf32>
    %c0_6 = arith.constant 0 : index
    %c0_7 = arith.constant 0 : index
    %8 = vector.load %arg10[%c0_6, %c0_7] : memref<8x128xf32, #tpu.memory_space<vmem>>, vector<8x128xf32>
    %c0_i32_8 = arith.constant 0 : i32
    %9 = arith.index_cast %c0_i32_8 : i32 to index
    %c0_9 = arith.constant 0 : index
    %c0_10 = arith.constant 0 : index
    %10 = vector.load %arg2[%9, %c0_9, %c0_10] : memref<8x8x128xf32, #tpu.memory_space<vmem>>, vector<1x8x128xf32>
    %11 = vector.shape_cast %10 : vector<1x8x128xf32> to vector<8x128xf32>
    %12 = tpu.concatenate %11, %7 in 1 : vector<8x128xf32>, vector<8x128xf32> -> vector<8x256xf32>
    %cst = arith.constant dense<0.000000e+00> : vector<8x512xf32>
    %13 = tpu.matmul %12, %3, %cst {dimension_numbers = #tpu.dot_dimension_numbers<[1], [0], [0], [1], [0, 0, 1, 1], [], []>} : vector<8x256xf32>, vector<256x512xf32>, vector<8x512xf32> -> vector<8x512xf32>
    %14 = arith.addf %13, %6 : vector<8x512xf32>
    %15 = vector.extract_strided_slice %14 {offsets = [0, 0], sizes = [8, 128], strides = [1, 1]} : vector<8x512xf32> to vector<8x128xf32>
    %16 = arith.negf %15 : vector<8x128xf32>
    %17 = math.exp %16 : vector<8x128xf32>
    %cst_11 = arith.constant 1.000000e+00 : f32
    %18 = vector.broadcast %cst_11 : f32 to vector<8x128xf32>
    %19 = arith.addf %18, %17 : vector<8x128xf32>
    %20 = arith.divf %18, %19 : vector<8x128xf32>
    %21 = vector.extract_strided_slice %14 {offsets = [0, 128], sizes = [8, 128], strides = [1, 1]} : vector<8x512xf32> to vector<8x128xf32>
    %22 = arith.negf %21 : vector<8x128xf32>
    %23 = math.exp %22 : vector<8x128xf32>
    %cst_12 = arith.constant 1.000000e+00 : f32
    %24 = vector.broadcast %cst_12 : f32 to vector<8x128xf32>
    %25 = arith.addf %24, %23 : vector<8x128xf32>
    %26 = arith.divf %24, %25 : vector<8x128xf32>
    %27 = vector.extract_strided_slice %14 {offsets = [0, 256], sizes = [8, 128], strides = [1, 1]} : vector<8x512xf32> to vector<8x128xf32>
    %28 = math.tanh %27 : vector<8x128xf32>
    %29 = vector.extract_strided_slice %14 {offsets = [0, 384], sizes = [8, 128], strides = [1, 1]} : vector<8x512xf32> to vector<8x128xf32>
    %30 = arith.negf %29 : vector<8x128xf32>
    %31 = math.exp %30 : vector<8x128xf32>
    %cst_13 = arith.constant 1.000000e+00 : f32
    %32 = vector.broadcast %cst_13 : f32 to vector<8x128xf32>
    %33 = arith.addf %32, %31 : vector<8x128xf32>
    %34 = arith.divf %32, %33 : vector<8x128xf32>
    %35 = arith.mulf %26, %8 : vector<8x128xf32>
    %36 = arith.mulf %20, %28 : vector<8x128xf32>
    %37 = arith.addf %35, %36 : vector<8x128xf32>
    %38 = math.tanh %37 : vector<8x128xf32>
    %39 = arith.mulf %34, %38 : vector<8x128xf32>
    %c1_i32 = arith.constant 1 : i32
    %40 = arith.index_cast %c1_i32 : i32 to index
    %c0_14 = arith.constant 0 : index
    %c0_15 = arith.constant 0 : index
    %41 = vector.load %arg2[%40, %c0_14, %c0_15] : memref<8x8x128xf32, #tpu.memory_space<vmem>>, vector<1x8x128xf32>
    %42 = vector.shape_cast %41 : vector<1x8x128xf32> to vector<8x128xf32>
    %43 = tpu.concatenate %42, %39 in 1 : vector<8x128xf32>, vector<8x128xf32> -> vector<8x256xf32>
    %cst_16 = arith.constant dense<0.000000e+00> : vector<8x512xf32>
    %44 = tpu.matmul %43, %3, %cst_16 {dimension_numbers = #tpu.dot_dimension_numbers<[1], [0], [0], [1], [0, 0, 1, 1], [], []>} : vector<8x256xf32>, vector<256x512xf32>, vector<8x512xf32> -> vector<8x512xf32>
    %45 = arith.addf %44, %6 : vector<8x512xf32>
    %46 = vector.extract_strided_slice %45 {offsets = [0, 0], sizes = [8, 128], strides = [1, 1]} : vector<8x512xf32> to vector<8x128xf32>
    %47 = arith.negf %46 : vector<8x128xf32>
    %48 = math.exp %47 : vector<8x128xf32>
    %cst_17 = arith.constant 1.000000e+00 : f32
    %49 = vector.broadcast %cst_17 : f32 to vector<8x128xf32>
    %50 = arith.addf %49, %48 : vector<8x128xf32>
    %51 = arith.divf %49, %50 : vector<8x128xf32>
    %52 = vector.extract_strided_slice %45 {offsets = [0, 128], sizes = [8, 128], strides = [1, 1]} : vector<8x512xf32> to vector<8x128xf32>
    %53 = arith.negf %52 : vector<8x128xf32>
    %54 = math.exp %53 : vector<8x128xf32>
    %cst_18 = arith.constant 1.000000e+00 : f32
    %55 = vector.broadcast %cst_18 : f32 to vector<8x128xf32>
    %56 = arith.addf %55, %54 : vector<8x128xf32>
    %57 = arith.divf %55, %56 : vector<8x128xf32>
    %58 = vector.extract_strided_slice %45 {offsets = [0, 256], sizes = [8, 128], strides = [1, 1]} : vector<8x512xf32> to vector<8x128xf32>
    %59 = math.tanh %58 : vector<8x128xf32>
    %60 = vector.extract_strided_slice %45 {offsets = [0, 384], sizes = [8, 128], strides = [1, 1]} : vector<8x512xf32> to vector<8x128xf32>
    %61 = arith.negf %60 : vector<8x128xf32>
    %62 = math.exp %61 : vector<8x128xf32>
    %cst_19 = arith.constant 1.000000e+00 : f32
    %63 = vector.broadcast %cst_19 : f32 to vector<8x128xf32>
    %64 = arith.addf %63, %62 : vector<8x128xf32>
    %65 = arith.divf %63, %64 : vector<8x128xf32>
    %66 = arith.mulf %57, %37 : vector<8x128xf32>
    %67 = arith.mulf %51, %59 : vector<8x128xf32>
    %68 = arith.addf %66, %67 : vector<8x128xf32>
    %69 = math.tanh %68 : vector<8x128xf32>
    %70 = arith.mulf %65, %69 : vector<8x128xf32>
    %c2_i32 = arith.constant 2 : i32
    %71 = arith.index_cast %c2_i32 : i32 to index
    %c0_20 = arith.constant 0 : index
    %c0_21 = arith.constant 0 : index
    %72 = vector.load %arg2[%71, %c0_20, %c0_21] : memref<8x8x128xf32, #tpu.memory_space<vmem>>, vector<1x8x128xf32>
    %73 = vector.shape_cast %72 : vector<1x8x128xf32> to vector<8x128xf32>
    %74 = tpu.concatenate %73, %70 in 1 : vector<8x128xf32>, vector<8x128xf32> -> vector<8x256xf32>
    %cst_22 = arith.constant dense<0.000000e+00> : vector<8x512xf32>
    %75 = tpu.matmul %74, %3, %cst_22 {dimension_numbers = #tpu.dot_dimension_numbers<[1], [0], [0], [1], [0, 0, 1, 1], [], []>} : vector<8x256xf32>, vector<256x512xf32>, vector<8x512xf32> -> vector<8x512xf32>
    %76 = arith.addf %75, %6 : vector<8x512xf32>
    %77 = vector.extract_strided_slice %76 {offsets = [0, 0], sizes = [8, 128], strides = [1, 1]} : vector<8x512xf32> to vector<8x128xf32>
    %78 = arith.negf %77 : vector<8x128xf32>
    %79 = math.exp %78 : vector<8x128xf32>
    %cst_23 = arith.constant 1.000000e+00 : f32
    %80 = vector.broadcast %cst_23 : f32 to vector<8x128xf32>
    %81 = arith.addf %80, %79 : vector<8x128xf32>
    %82 = arith.divf %80, %81 : vector<8x128xf32>
    %83 = vector.extract_strided_slice %76 {offsets = [0, 128], sizes = [8, 128], strides = [1, 1]} : vector<8x512xf32> to vector<8x128xf32>
    %84 = arith.negf %83 : vector<8x128xf32>
    %85 = math.exp %84 : vector<8x128xf32>
    %cst_24 = arith.constant 1.000000e+00 : f32
    %86 = vector.broadcast %cst_24 : f32 to vector<8x128xf32>
    %87 = arith.addf %86, %85 : vector<8x128xf32>
    %88 = arith.divf %86, %87 : vector<8x128xf32>
    %89 = vector.extract_strided_slice %76 {offsets = [0, 256], sizes = [8, 128], strides = [1, 1]} : vector<8x512xf32> to vector<8x128xf32>
    %90 = math.tanh %89 : vector<8x128xf32>
    %91 = vector.extract_strided_slice %76 {offsets = [0, 384], sizes = [8, 128], strides = [1, 1]} : vector<8x512xf32> to vector<8x128xf32>
    %92 = arith.negf %91 : vector<8x128xf32>
    %93 = math.exp %92 : vector<8x128xf32>
    %cst_25 = arith.constant 1.000000e+00 : f32
    %94 = vector.broadcast %cst_25 : f32 to vector<8x128xf32>
    %95 = arith.addf %94, %93 : vector<8x128xf32>
    %96 = arith.divf %94, %95 : vector<8x128xf32>
    %97 = arith.mulf %88, %68 : vector<8x128xf32>
    %98 = arith.mulf %82, %90 : vector<8x128xf32>
    %99 = arith.addf %97, %98 : vector<8x128xf32>
    %100 = math.tanh %99 : vector<8x128xf32>
    %101 = arith.mulf %96, %100 : vector<8x128xf32>
    %c3_i32 = arith.constant 3 : i32
    %102 = arith.index_cast %c3_i32 : i32 to index
    %c0_26 = arith.constant 0 : index
    %c0_27 = arith.constant 0 : index
    %103 = vector.load %arg2[%102, %c0_26, %c0_27] : memref<8x8x128xf32, #tpu.memory_space<vmem>>, vector<1x8x128xf32>
    %104 = vector.shape_cast %103 : vector<1x8x128xf32> to vector<8x128xf32>
    %105 = tpu.concatenate %104, %101 in 1 : vector<8x128xf32>, vector<8x128xf32> -> vector<8x256xf32>
    %cst_28 = arith.constant dense<0.000000e+00> : vector<8x512xf32>
    %106 = tpu.matmul %105, %3, %cst_28 {dimension_numbers = #tpu.dot_dimension_numbers<[1], [0], [0], [1], [0, 0, 1, 1], [], []>} : vector<8x256xf32>, vector<256x512xf32>, vector<8x512xf32> -> vector<8x512xf32>
    %107 = arith.addf %106, %6 : vector<8x512xf32>
    %108 = vector.extract_strided_slice %107 {offsets = [0, 0], sizes = [8, 128], strides = [1, 1]} : vector<8x512xf32> to vector<8x128xf32>
    %109 = arith.negf %108 : vector<8x128xf32>
    %110 = math.exp %109 : vector<8x128xf32>
    %cst_29 = arith.constant 1.000000e+00 : f32
    %111 = vector.broadcast %cst_29 : f32 to vector<8x128xf32>
    %112 = arith.addf %111, %110 : vector<8x128xf32>
    %113 = arith.divf %111, %112 : vector<8x128xf32>
    %114 = vector.extract_strided_slice %107 {offsets = [0, 128], sizes = [8, 128], strides = [1, 1]} : vector<8x512xf32> to vector<8x128xf32>
    %115 = arith.negf %114 : vector<8x128xf32>
    %116 = math.exp %115 : vector<8x128xf32>
    %cst_30 = arith.constant 1.000000e+00 : f32
    %117 = vector.broadcast %cst_30 : f32 to vector<8x128xf32>
    %118 = arith.addf %117, %116 : vector<8x128xf32>
    %119 = arith.divf %117, %118 : vector<8x128xf32>
    %120 = vector.extract_strided_slice %107 {offsets = [0, 256], sizes = [8, 128], strides = [1, 1]} : vector<8x512xf32> to vector<8x128xf32>
    %121 = math.tanh %120 : vector<8x128xf32>
    %122 = vector.extract_strided_slice %107 {offsets = [0, 384], sizes = [8, 128], strides = [1, 1]} : vector<8x512xf32> to vector<8x128xf32>
    %123 = arith.negf %122 : vector<8x128xf32>
    %124 = math.exp %123 : vector<8x128xf32>
    %cst_31 = arith.constant 1.000000e+00 : f32
    %125 = vector.broadcast %cst_31 : f32 to vector<8x128xf32>
    %126 = arith.addf %125, %124 : vector<8x128xf32>
    %127 = arith.divf %125, %126 : vector<8x128xf32>
    %128 = arith.mulf %119, %99 : vector<8x128xf32>
    %129 = arith.mulf %113, %121 : vector<8x128xf32>
    %130 = arith.addf %128, %129 : vector<8x128xf32>
    %131 = math.tanh %130 : vector<8x128xf32>
    %132 = arith.mulf %127, %131 : vector<8x128xf32>
    %c4_i32 = arith.constant 4 : i32
    %133 = arith.index_cast %c4_i32 : i32 to index
    %c0_32 = arith.constant 0 : index
    %c0_33 = arith.constant 0 : index
    %134 = vector.load %arg2[%133, %c0_32, %c0_33] : memref<8x8x128xf32, #tpu.memory_space<vmem>>, vector<1x8x128xf32>
    %135 = vector.shape_cast %134 : vector<1x8x128xf32> to vector<8x128xf32>
    %136 = tpu.concatenate %135, %132 in 1 : vector<8x128xf32>, vector<8x128xf32> -> vector<8x256xf32>
    %cst_34 = arith.constant dense<0.000000e+00> : vector<8x512xf32>
    %137 = tpu.matmul %136, %3, %cst_34 {dimension_numbers = #tpu.dot_dimension_numbers<[1], [0], [0], [1], [0, 0, 1, 1], [], []>} : vector<8x256xf32>, vector<256x512xf32>, vector<8x512xf32> -> vector<8x512xf32>
    %138 = arith.addf %137, %6 : vector<8x512xf32>
    %139 = vector.extract_strided_slice %138 {offsets = [0, 0], sizes = [8, 128], strides = [1, 1]} : vector<8x512xf32> to vector<8x128xf32>
    %140 = arith.negf %139 : vector<8x128xf32>
    %141 = math.exp %140 : vector<8x128xf32>
    %cst_35 = arith.constant 1.000000e+00 : f32
    %142 = vector.broadcast %cst_35 : f32 to vector<8x128xf32>
    %143 = arith.addf %142, %141 : vector<8x128xf32>
    %144 = arith.divf %142, %143 : vector<8x128xf32>
    %145 = vector.extract_strided_slice %138 {offsets = [0, 128], sizes = [8, 128], strides = [1, 1]} : vector<8x512xf32> to vector<8x128xf32>
    %146 = arith.negf %145 : vector<8x128xf32>
    %147 = math.exp %146 : vector<8x128xf32>
    %cst_36 = arith.constant 1.000000e+00 : f32
    %148 = vector.broadcast %cst_36 : f32 to vector<8x128xf32>
    %149 = arith.addf %148, %147 : vector<8x128xf32>
    %150 = arith.divf %148, %149 : vector<8x128xf32>
    %151 = vector.extract_strided_slice %138 {offsets = [0, 256], sizes = [8, 128], strides = [1, 1]} : vector<8x512xf32> to vector<8x128xf32>
    %152 = math.tanh %151 : vector<8x128xf32>
    %153 = vector.extract_strided_slice %138 {offsets = [0, 384], sizes = [8, 128], strides = [1, 1]} : vector<8x512xf32> to vector<8x128xf32>
    %154 = arith.negf %153 : vector<8x128xf32>
    %155 = math.exp %154 : vector<8x128xf32>
    %cst_37 = arith.constant 1.000000e+00 : f32
    %156 = vector.broadcast %cst_37 : f32 to vector<8x128xf32>
    %157 = arith.addf %156, %155 : vector<8x128xf32>
    %158 = arith.divf %156, %157 : vector<8x128xf32>
    %159 = arith.mulf %150, %130 : vector<8x128xf32>
    %160 = arith.mulf %144, %152 : vector<8x128xf32>
    %161 = arith.addf %159, %160 : vector<8x128xf32>
    %162 = math.tanh %161 : vector<8x128xf32>
    %163 = arith.mulf %158, %162 : vector<8x128xf32>
    %c5_i32 = arith.constant 5 : i32
    %164 = arith.index_cast %c5_i32 : i32 to index
    %c0_38 = arith.constant 0 : index
    %c0_39 = arith.constant 0 : index
    %165 = vector.load %arg2[%164, %c0_38, %c0_39] : memref<8x8x128xf32, #tpu.memory_space<vmem>>, vector<1x8x128xf32>
    %166 = vector.shape_cast %165 : vector<1x8x128xf32> to vector<8x128xf32>
    %167 = tpu.concatenate %166, %163 in 1 : vector<8x128xf32>, vector<8x128xf32> -> vector<8x256xf32>
    %cst_40 = arith.constant dense<0.000000e+00> : vector<8x512xf32>
    %168 = tpu.matmul %167, %3, %cst_40 {dimension_numbers = #tpu.dot_dimension_numbers<[1], [0], [0], [1], [0, 0, 1, 1], [], []>} : vector<8x256xf32>, vector<256x512xf32>, vector<8x512xf32> -> vector<8x512xf32>
    %169 = arith.addf %168, %6 : vector<8x512xf32>
    %170 = vector.extract_strided_slice %169 {offsets = [0, 0], sizes = [8, 128], strides = [1, 1]} : vector<8x512xf32> to vector<8x128xf32>
    %171 = arith.negf %170 : vector<8x128xf32>
    %172 = math.exp %171 : vector<8x128xf32>
    %cst_41 = arith.constant 1.000000e+00 : f32
    %173 = vector.broadcast %cst_41 : f32 to vector<8x128xf32>
    %174 = arith.addf %173, %172 : vector<8x128xf32>
    %175 = arith.divf %173, %174 : vector<8x128xf32>
    %176 = vector.extract_strided_slice %169 {offsets = [0, 128], sizes = [8, 128], strides = [1, 1]} : vector<8x512xf32> to vector<8x128xf32>
    %177 = arith.negf %176 : vector<8x128xf32>
    %178 = math.exp %177 : vector<8x128xf32>
    %cst_42 = arith.constant 1.000000e+00 : f32
    %179 = vector.broadcast %cst_42 : f32 to vector<8x128xf32>
    %180 = arith.addf %179, %178 : vector<8x128xf32>
    %181 = arith.divf %179, %180 : vector<8x128xf32>
    %182 = vector.extract_strided_slice %169 {offsets = [0, 256], sizes = [8, 128], strides = [1, 1]} : vector<8x512xf32> to vector<8x128xf32>
    %183 = math.tanh %182 : vector<8x128xf32>
    %184 = vector.extract_strided_slice %169 {offsets = [0, 384], sizes = [8, 128], strides = [1, 1]} : vector<8x512xf32> to vector<8x128xf32>
    %185 = arith.negf %184 : vector<8x128xf32>
    %186 = math.exp %185 : vector<8x128xf32>
    %cst_43 = arith.constant 1.000000e+00 : f32
    %187 = vector.broadcast %cst_43 : f32 to vector<8x128xf32>
    %188 = arith.addf %187, %186 : vector<8x128xf32>
    %189 = arith.divf %187, %188 : vector<8x128xf32>
    %190 = arith.mulf %181, %161 : vector<8x128xf32>
    %191 = arith.mulf %175, %183 : vector<8x128xf32>
    %192 = arith.addf %190, %191 : vector<8x128xf32>
    %193 = math.tanh %192 : vector<8x128xf32>
    %194 = arith.mulf %189, %193 : vector<8x128xf32>
    %c6_i32 = arith.constant 6 : i32
    %195 = arith.index_cast %c6_i32 : i32 to index
    %c0_44 = arith.constant 0 : index
    %c0_45 = arith.constant 0 : index
    %196 = vector.load %arg2[%195, %c0_44, %c0_45] : memref<8x8x128xf32, #tpu.memory_space<vmem>>, vector<1x8x128xf32>
    %197 = vector.shape_cast %196 : vector<1x8x128xf32> to vector<8x128xf32>
    %198 = tpu.concatenate %197, %194 in 1 : vector<8x128xf32>, vector<8x128xf32> -> vector<8x256xf32>
    %cst_46 = arith.constant dense<0.000000e+00> : vector<8x512xf32>
    %199 = tpu.matmul %198, %3, %cst_46 {dimension_numbers = #tpu.dot_dimension_numbers<[1], [0], [0], [1], [0, 0, 1, 1], [], []>} : vector<8x256xf32>, vector<256x512xf32>, vector<8x512xf32> -> vector<8x512xf32>
    %200 = arith.addf %199, %6 : vector<8x512xf32>
    %201 = vector.extract_strided_slice %200 {offsets = [0, 0], sizes = [8, 128], strides = [1, 1]} : vector<8x512xf32> to vector<8x128xf32>
    %202 = arith.negf %201 : vector<8x128xf32>
    %203 = math.exp %202 : vector<8x128xf32>
    %cst_47 = arith.constant 1.000000e+00 : f32
    %204 = vector.broadcast %cst_47 : f32 to vector<8x128xf32>
    %205 = arith.addf %204, %203 : vector<8x128xf32>
    %206 = arith.divf %204, %205 : vector<8x128xf32>
    %207 = vector.extract_strided_slice %200 {offsets = [0, 128], sizes = [8, 128], strides = [1, 1]} : vector<8x512xf32> to vector<8x128xf32>
    %208 = arith.negf %207 : vector<8x128xf32>
    %209 = math.exp %208 : vector<8x128xf32>
    %cst_48 = arith.constant 1.000000e+00 : f32
    %210 = vector.broadcast %cst_48 : f32 to vector<8x128xf32>
    %211 = arith.addf %210, %209 : vector<8x128xf32>
    %212 = arith.divf %210, %211 : vector<8x128xf32>
    %213 = vector.extract_strided_slice %200 {offsets = [0, 256], sizes = [8, 128], strides = [1, 1]} : vector<8x512xf32> to vector<8x128xf32>
    %214 = math.tanh %213 : vector<8x128xf32>
    %215 = vector.extract_strided_slice %200 {offsets = [0, 384], sizes = [8, 128], strides = [1, 1]} : vector<8x512xf32> to vector<8x128xf32>
    %216 = arith.negf %215 : vector<8x128xf32>
    %217 = math.exp %216 : vector<8x128xf32>
    %cst_49 = arith.constant 1.000000e+00 : f32
    %218 = vector.broadcast %cst_49 : f32 to vector<8x128xf32>
    %219 = arith.addf %218, %217 : vector<8x128xf32>
    %220 = arith.divf %218, %219 : vector<8x128xf32>
    %221 = arith.mulf %212, %192 : vector<8x128xf32>
    %222 = arith.mulf %206, %214 : vector<8x128xf32>
    %223 = arith.addf %221, %222 : vector<8x128xf32>
    %224 = math.tanh %223 : vector<8x128xf32>
    %225 = arith.mulf %220, %224 : vector<8x128xf32>
    %c7_i32 = arith.constant 7 : i32
    %226 = arith.index_cast %c7_i32 : i32 to index
    %c0_50 = arith.constant 0 : index
    %c0_51 = arith.constant 0 : index
    %227 = vector.load %arg2[%226, %c0_50, %c0_51] : memref<8x8x128xf32, #tpu.memory_space<vmem>>, vector<1x8x128xf32>
    %228 = vector.shape_cast %227 : vector<1x8x128xf32> to vector<8x128xf32>
    %229 = tpu.concatenate %228, %225 in 1 : vector<8x128xf32>, vector<8x128xf32> -> vector<8x256xf32>
    %cst_52 = arith.constant dense<0.000000e+00> : vector<8x512xf32>
    %230 = tpu.matmul %229, %3, %cst_52 {dimension_numbers = #tpu.dot_dimension_numbers<[1], [0], [0], [1], [0, 0, 1, 1], [], []>} : vector<8x256xf32>, vector<256x512xf32>, vector<8x512xf32> -> vector<8x512xf32>
    %231 = arith.addf %230, %6 : vector<8x512xf32>
    %232 = vector.extract_strided_slice %231 {offsets = [0, 0], sizes = [8, 128], strides = [1, 1]} : vector<8x512xf32> to vector<8x128xf32>
    %233 = arith.negf %232 : vector<8x128xf32>
    %234 = math.exp %233 : vector<8x128xf32>
    %cst_53 = arith.constant 1.000000e+00 : f32
    %235 = vector.broadcast %cst_53 : f32 to vector<8x128xf32>
    %236 = arith.addf %235, %234 : vector<8x128xf32>
    %237 = arith.divf %235, %236 : vector<8x128xf32>
    %238 = vector.extract_strided_slice %231 {offsets = [0, 128], sizes = [8, 128], strides = [1, 1]} : vector<8x512xf32> to vector<8x128xf32>
    %239 = arith.negf %238 : vector<8x128xf32>
    %240 = math.exp %239 : vector<8x128xf32>
    %cst_54 = arith.constant 1.000000e+00 : f32
    %241 = vector.broadcast %cst_54 : f32 to vector<8x128xf32>
    %242 = arith.addf %241, %240 : vector<8x128xf32>
    %243 = arith.divf %241, %242 : vector<8x128xf32>
    %244 = vector.extract_strided_slice %231 {offsets = [0, 256], sizes = [8, 128], strides = [1, 1]} : vector<8x512xf32> to vector<8x128xf32>
    %245 = math.tanh %244 : vector<8x128xf32>
    %246 = vector.extract_strided_slice %231 {offsets = [0, 384], sizes = [8, 128], strides = [1, 1]} : vector<8x512xf32> to vector<8x128xf32>
    %247 = arith.negf %246 : vector<8x128xf32>
    %248 = math.exp %247 : vector<8x128xf32>
    %cst_55 = arith.constant 1.000000e+00 : f32
    %249 = vector.broadcast %cst_55 : f32 to vector<8x128xf32>
    %250 = arith.addf %249, %248 : vector<8x128xf32>
    %251 = arith.divf %249, %250 : vector<8x128xf32>
    %252 = arith.mulf %243, %223 : vector<8x128xf32>
    %253 = arith.mulf %237, %245 : vector<8x128xf32>
    %254 = arith.addf %252, %253 : vector<8x128xf32>
    %255 = math.tanh %254 : vector<8x128xf32>
    %256 = arith.mulf %251, %255 : vector<8x128xf32>
    %c8_i32 = arith.constant 8 : i32
    %c0_56 = arith.constant 0 : index
    %c0_57 = arith.constant 0 : index
    %257 = vector.load %arg9[%c0_56, %c0_57] : memref<8x128xf32, #tpu.memory_space<vmem>>, vector<8x128xf32>
    tpu.vector_store %arg9[%c0_56, %c0_57], %256 {strides = array<i32>} : memref<8x128xf32, #tpu.memory_space<vmem>>, vector<8x128xf32>,
    %c0_58 = arith.constant 0 : index
    %c0_59 = arith.constant 0 : index
    %258 = vector.load %arg10[%c0_58, %c0_59] : memref<8x128xf32, #tpu.memory_space<vmem>>, vector<8x128xf32>
    tpu.vector_store %arg10[%c0_58, %c0_59], %254 {strides = array<i32>} : memref<8x128xf32, #tpu.memory_space<vmem>>, vector<8x128xf32>,
    %c0_i32_60 = arith.constant 0 : i32
    %259 = arith.cmpi eq, %arg1, %c0_i32_60 : i32
    %260 = arith.extui %259 : i1 to i32
    %c0_i32_61 = arith.constant 0 : i32
    %261 = arith.cmpi ne, %260, %c0_i32_61 : i32
    scf.if %261 {
      %c0_62 = arith.constant 0 : index
      %c0_63 = arith.constant 0 : index
      %c0_64 = arith.constant 0 : index
      %262 = vector.load %arg7[%c0_62, %c0_63, %c0_64] : memref<1x8x128xf32, #tpu.memory_space<vmem>>, vector<1x8x128xf32>
      %263 = vector.shape_cast %262 : vector<1x8x128xf32> to vector<8x128xf32>
      %264 = vector.shape_cast %256 : vector<8x128xf32> to vector<1x8x128xf32>
      tpu.vector_store %arg7[%c0_62, %c0_63, %c0_64], %264 {strides = array<i32>} : memref<1x8x128xf32, #tpu.memory_space<vmem>>, vector<1x8x128xf32>,
      %c0_65 = arith.constant 0 : index
      %c0_66 = arith.constant 0 : index
      %c0_67 = arith.constant 0 : index
      %265 = vector.load %arg8[%c0_65, %c0_66, %c0_67] : memref<1x8x128xf32, #tpu.memory_space<vmem>>, vector<1x8x128xf32>
      %266 = vector.shape_cast %265 : vector<1x8x128xf32> to vector<8x128xf32>
      %267 = vector.shape_cast %254 : vector<8x128xf32> to vector<1x8x128xf32>
      tpu.vector_store %arg8[%c0_65, %c0_66, %c0_67], %267 {strides = array<i32>} : memref<1x8x128xf32, #tpu.memory_space<vmem>>, vector<1x8x128xf32>,
    } else {
    }
    return
  }
  func.func @transform_0(%arg0: i32, %arg1: i32) -> (i32, i32, i32) {
    %c0_i32 = arith.constant 0 : i32
    %c0_i32_0 = arith.constant 0 : i32
    return %arg1, %arg0, %c0_i32 : i32, i32, i32
  }
  func.func @transform_1(%arg0: i32, %arg1: i32) -> (i32, i32, i32) {
    %c0_i32 = arith.constant 0 : i32
    %c0_i32_0 = arith.constant 0 : i32
    %c0_i32_1 = arith.constant 0 : i32
    return %c0_i32, %arg0, %c0_i32_0 : i32, i32, i32
  }
  func.func @transform_2(%arg0: i32, %arg1: i32) -> (i32, i32, i32) {
    %c0_i32 = arith.constant 0 : i32
    %c0_i32_0 = arith.constant 0 : i32
    %c0_i32_1 = arith.constant 0 : i32
    return %c0_i32, %arg0, %c0_i32_0 : i32, i32, i32
  }
  func.func @transform_3(%arg0: i32, %arg1: i32) -> (i32, i32) {
    %c0_i32 = arith.constant 0 : i32
    %c0_i32_0 = arith.constant 0 : i32
    %c0_i32_1 = arith.constant 0 : i32
    return %c0_i32, %c0_i32_0 : i32, i32
  }
  func.func @transform_4(%arg0: i32, %arg1: i32) -> (i32, i32) {
    %c0_i32 = arith.constant 0 : i32
    %c0_i32_0 = arith.constant 0 : i32
    %c0_i32_1 = arith.constant 0 : i32
    return %c0_i32, %c0_i32_0 : i32, i32
  }
  func.func @transform_5(%arg0: i32, %arg1: i32) -> (i32, i32, i32) {
    %c0_i32 = arith.constant 0 : i32
    %c0_i32_0 = arith.constant 0 : i32
    %c0_i32_1 = arith.constant 0 : i32
    return %c0_i32, %arg0, %c0_i32_0 : i32, i32, i32
  }
  func.func @transform_6(%arg0: i32, %arg1: i32) -> (i32, i32, i32) {
    %c0_i32 = arith.constant 0 : i32
    %c0_i32_0 = arith.constant 0 : i32
    %c0_i32_1 = arith.constant 0 : i32
    return %c0_i32, %arg0, %c0_i32_0 : i32, i32, i32
  }
}

</mosaic_0001>

<bundles_post_ra>
// kernel: lstm_pallas.1
= control target key start
LH: loop header
LB: loop body
LE: loop exit
PB: predicated region body
PF: predicated region fallthrough
CT: control target
= control target key end

     0   :  { %s3885_s3 = inlined_call_operand.vmem [shape: f32[256,512], index: 3, kind: input, shape index: {}]   ;;  %s3886_s1 = inlined_call_operand.vmem [shape: f32[1,8,128], index: 1, kind: input, shape index: {}]   ;;  %s3887_s0 = inlined_call_operand.vmem [shape: f32[8,8,128], index: 0, kind: input, shape index: {}]   ;;  %s3888_s4 = inlined_call_operand.vmem [shape: f32[1,512], index: 4, kind: input, shape index: {}]   ;;  %s3889_s2 = inlined_call_operand.vmem [shape: f32[1,8,128], index: 2, kind: input, shape index: {}]   ;;  %s3890_s6 = inlined_call_operand.vmem [shape: f32[1,8,128], index: 6, kind: output, shape index: {1}]   ;;  %s3891_s5 = inlined_call_operand.vmem [shape: f32[1,8,128], index: 5, kind: output, shape index: {0}]  }
   0x1   :  { %v31_v0 = vld [vmem:[%s3885_s3 + $0x8] sm:$0xff]  ;;  %v30_v2 = vld [vmem:[%s3885_s3] sm:$0xff]  ;;  %v33_v18 = vld [vmem:[%s3885_s3 + $0x18] sm:$0xff] }
   0x2   :  { %v35_v1 = vld [vmem:[%s3885_s3 + $0x28] sm:$0xff]  ;;  %v34_v4 = vld [vmem:[%s3885_s3 + $0x20] sm:$0xff]  ;;  %v37_v19 = vld [vmem:[%s3885_s3 + $0x38] sm:$0xff] }
   0x3   :  { %v2767_v3 = vpack.c.bf16 %v35_v1, %v31_v0  ;;  %v39_v5 = vld [vmem:[%s3885_s3 + $0x48] sm:$0xff]  ;;  %v2778_v7 = vpack.c.bf16 %v34_v4, %v30_v2  ;;  %v38_v9 = vld [vmem:[%s3885_s3 + $0x40] sm:$0xff]  ;;  %v2819_v21 = vpack.c.bf16 %v37_v19, %v33_v18  ;;  %v32_v22 = vld [vmem:[%s3885_s3 + $0x10] sm:$0xff] }
   0x4   :  { %v43_v6 = vld [vmem:[%s3885_s3 + $0x68] sm:$0xff]  ;;  %v42_v10 = vld [vmem:[%s3885_s3 + $0x60] sm:$0xff]  ;;  %v36_v23 = vld [vmem:[%s3885_s3 + $0x30] sm:$0xff] }
   0x5   :  { %3936 = vst [vmem:[#allocation4_spill] sm:$0xff] %v2767_v3  ;;  %v2780_v8 = vpack.c.bf16 %v43_v6, %v39_v5  ;;  %v47_v11 = vld [vmem:[%s3885_s3 + $0x88] sm:$0xff]  ;;  %1572 = vmatprep.subr.bf16.mxu0 %v2767_v3  ;;  %v2796_v13 = vpack.c.bf16 %v42_v10, %v38_v9  ;;  %v46_v14 = vld [vmem:[%s3885_s3 + $0x80] sm:$0xff]  ;;  %3937 = vst [vmem:[#allocation5_spill] sm:$0xff] %v2819_v21  ;;  %v2827_v24 = vpack.c.bf16 %v36_v23, %v32_v22 }
   0x6   :  { %v51_v12 = vld [vmem:[%s3885_s3 + $0xa8] sm:$0xff]  ;;  %1574 = vmatpush1.bf16.msra.mxu0 %v2778_v7  ;;  %v50_v15 = vld [vmem:[%s3885_s3 + $0xa0] sm:$0xff]  ;;  %1636 = vmatprep.subr.bf16.mxu1 %v2819_v21  ;;  %v41_v26 = vld [vmem:[%s3885_s3 + $0x58] sm:$0xff] }
   0x7   :  { %1576 = vmatprep.subr.bf16.mxu0 %v2780_v8  ;;  %v2805_v16 = vpack.c.bf16 %v51_v12, %v47_v11  ;;  %v55_v17 = vld [vmem:[%s3885_s3 + $0xc8] sm:$0xff]  ;;  %v2830_v25 = vpack.c.bf16 %v50_v15, %v46_v14  ;;  %v45_v27 = vld [vmem:[%s3885_s3 + $0x78] sm:$0xff]  ;;  %v40_v28 = vld [vmem:[%s3885_s3 + $0x50] sm:$0xff]  ;;  %1638 = vmatpush1.bf16.msra.mxu1 %v2827_v24 }
   0x8   :  { %v59_v20 = vld [vmem:[%s3885_s3 + $0xe8] sm:$0xff]  ;;  %v54_v30 = vld [vmem:[%s3885_s3 + $0xc0] sm:$0xff]  ;;  %v2852_v32 = vpack.c.bf16 %v45_v27, %v41_v26  ;;  %v44_v33 = vld [vmem:[%s3885_s3 + $0x70] sm:$0xff] }
   0x9   :  { %v2843_v29 = vpack.c.bf16 %v59_v20, %v55_v17  ;;  %v58_v31 = vld [vmem:[%s3885_s3 + $0xe0] sm:$0xff]  ;;  %v63_v34 = vld [vmem:[%s3885_s3 + $0x108] sm:$0xff]  ;;  %v2863_v36 = vpack.c.bf16 %v44_v33, %v40_v28  ;;  %v49_v37 = vld [vmem:[%s3885_s3 + $0x98] sm:$0xff] }
   0xa   :  { %1578 = vmatpush1.bf16.msra.mxu0 %v2796_v13  ;;  %v67_v35 = vld [vmem:[%s3885_s3 + $0x128] sm:$0xff]  ;;  %1640 = vmatprep.subr.bf16.mxu1 %v2852_v32  ;;  %v53_v38 = vld [vmem:[%s3885_s3 + $0xb8] sm:$0xff]  ;;  %v48_v39 = vld [vmem:[%s3885_s3 + $0x90] sm:$0xff]  ;;  %v2879_v41 = vpack.c.bf16 %v58_v31, %v54_v30 }
   0xb   :  { %1580 = vmatprep.subr.bf16.mxu0 %v2805_v16  ;;  %v52_v40 = vld [vmem:[%s3885_s3 + $0xb0] sm:$0xff]  ;;  %v62_v42 = vld [vmem:[%s3885_s3 + $0x100] sm:$0xff]  ;;  %v2887_v44 = vpack.c.bf16 %v53_v38, %v49_v37  ;;  %v2890_v45 = vpack.c.bf16 %v67_v35, %v63_v34  ;;  %1642 = vmatpush1.bf16.msra.mxu1 %v2863_v36  ;;  %v71_v46 = vld [vmem:[%s3885_s3 + $0x148] sm:$0xff] }
   0xc   :  { %v66_v43 = vld [vmem:[%s3885_s3 + $0x120] sm:$0xff]  ;;  %v2896_v47 = vpack.c.bf16 %v52_v40, %v48_v39  ;;  %v57_v48 = vld [vmem:[%s3885_s3 + $0xd8] sm:$0xff]  ;;  %v75_v50 = vld [vmem:[%s3885_s3 + $0x168] sm:$0xff] }
   0xd   :  { %v61_v49 = vld [vmem:[%s3885_s3 + $0xf8] sm:$0xff]  ;;  %1644 = vmatprep.subr.bf16.mxu1 %v2887_v44  ;;  %v56_v52 = vld [vmem:[%s3885_s3 + $0xd0] sm:$0xff]  ;;  %v2917_v54 = vpack.c.bf16 %v66_v43, %v62_v42  ;;  %v2926_v57 = vpack.c.bf16 %v75_v50, %v71_v46  ;;  %v70_v58 = vld [vmem:[%s3885_s3 + $0x140] sm:$0xff] }
   0xe   :  { %1582 = vmatpush1.bf16.msra.mxu0 %v2830_v25  ;;  %v2908_v51 = vpack.c.bf16 %v61_v49, %v57_v48  ;;  %v60_v53 = vld [vmem:[%s3885_s3 + $0xf0] sm:$0xff]  ;;  %v65_v55 = vld [vmem:[%s3885_s3 + $0x118] sm:$0xff]  ;;  %v74_v59 = vld [vmem:[%s3885_s3 + $0x160] sm:$0xff] }
   0xf   :  { %1584 = vmatprep.subr.bf16.mxu0 %v2843_v29  ;;  %v69_v56 = vld [vmem:[%s3885_s3 + $0x138] sm:$0xff]  ;;  %1646 = vmatpush1.bf16.msra.mxu1 %v2896_v47  ;;  %v79_v60 = vld [vmem:[%s3885_s3 + $0x188] sm:$0xff]  ;;  %v2938_v61 = vpack.c.bf16 %v60_v53, %v56_v52  ;;  %v64_v0 = vld [vmem:[%s3885_s3 + $0x110] sm:$0xff]  ;;  %v2959_v5 = vpack.c.bf16 %v74_v59, %v70_v58 }
  0x10   :  { %v83_v62 = vld [vmem:[%s3885_s3 + $0x1a8] sm:$0xff]  ;;  %1648 = vmatprep.subr.bf16.mxu1 %v2908_v51  ;;  %v2944_v63 = vpack.c.bf16 %v69_v56, %v65_v55  ;;  %v68_v1 = vld [vmem:[%s3885_s3 + $0x130] sm:$0xff]  ;;  %v73_v2 = vld [vmem:[%s3885_s3 + $0x158] sm:$0xff] }
  0x11   :  { %v77_v4 = vld [vmem:[%s3885_s3 + $0x178] sm:$0xff]  ;;  %v2962_v6 = vpack.c.bf16 %v83_v62, %v79_v60  ;;  %v78_v9 = vld [vmem:[%s3885_s3 + $0x180] sm:$0xff]  ;;  %v87_v11 = vld [vmem:[%s3885_s3 + $0x1c8] sm:$0xff]  ;;  %v2974_v12 = vpack.c.bf16 %v68_v1, %v64_v0 }
  0x12   :  { %1586 = vmatpush1.bf16.msra.mxu0 %v2879_v41  ;;  %v82_v10 = vld [vmem:[%s3885_s3 + $0x1a0] sm:$0xff]  ;;  %v91_v14 = vld [vmem:[%s3885_s3 + $0x1e8] sm:$0xff]  ;;  %v2980_v15 = vpack.c.bf16 %v77_v4, %v73_v2  ;;  %v72_v17 = vld [vmem:[%s3885_s3 + $0x150] sm:$0xff] }
  0x13   :  { %1588 = vmatprep.subr.bf16.mxu0 %v2890_v45  ;;  %1650 = vmatpush1.bf16.msra.mxu1 %v2938_v61  ;;  %v76_v18 = vld [vmem:[%s3885_s3 + $0x170] sm:$0xff]  ;;  %v81_v19 = vld [vmem:[%s3885_s3 + $0x198] sm:$0xff]  ;;  %v2995_v22 = vpack.c.bf16 %v82_v10, %v78_v9  ;;  %v2998_v23 = vpack.c.bf16 %v91_v14, %v87_v11  ;;  %v86_v26 = vld [vmem:[%s3885_s3 + $0x1c0] sm:$0xff] }
  0x14   :  { %1652 = vmatprep.subr.bf16.mxu1 %v2944_v63  ;;  %v85_v20 = vld [vmem:[%s3885_s3 + $0x1b8] sm:$0xff]  ;;  %v90_v27 = vld [vmem:[%s3885_s3 + $0x1e0] sm:$0xff]  ;;  %v95_v28 = vld [vmem:[%s3885_s3 + $0x208] sm:$0xff]  ;;  %v3010_v30 = vpack.c.bf16 %v76_v18, %v72_v17 }
  0x15   :  { %v99_v31 = vld [vmem:[%s3885_s3 + $0x228] sm:$0xff]  ;;  %v3016_v33 = vpack.c.bf16 %v85_v20, %v81_v19  ;;  %v80_v34 = vld [vmem:[%s3885_s3 + $0x190] sm:$0xff]  ;;  %v89_v37 = vld [vmem:[%s3885_s3 + $0x1d8] sm:$0xff]  ;;  %v3031_v39 = vpack.c.bf16 %v90_v27, %v86_v26 }
  0x16   :  { %1590 = vmatpush1.bf16.msra.mxu0 %v2917_v54  ;;  %v84_v35 = vld [vmem:[%s3885_s3 + $0x1b0] sm:$0xff]  ;;  %v93_v38 = vld [vmem:[%s3885_s3 + $0x1f8] sm:$0xff]  ;;  %v3034_v40 = vpack.c.bf16 %v99_v31, %v95_v28  ;;  %v94_v42 = vld [vmem:[%s3885_s3 + $0x200] sm:$0xff] }
  0x17   :  { %1592 = vmatprep.subr.bf16.mxu0 %v2926_v57  ;;  %1654 = vmatpush1.bf16.msra.mxu1 %v2974_v12  ;;  %v98_v43 = vld [vmem:[%s3885_s3 + $0x220] sm:$0xff]  ;;  %v103_v46 = vld [vmem:[%s3885_s3 + $0x248] sm:$0xff]  ;;  %v3046_v48 = vpack.c.bf16 %v84_v35, %v80_v34  ;;  %v3052_v50 = vpack.c.bf16 %v93_v38, %v89_v37  ;;  %v88_v52 = vld [vmem:[%s3885_s3 + $0x1d0] sm:$0xff] }
  0x18   :  { %1656 = vmatprep.subr.bf16.mxu1 %v2980_v15  ;;  %v107_v49 = vld [vmem:[%s3885_s3 + $0x268] sm:$0xff]  ;;  %v92_v53 = vld [vmem:[%s3885_s3 + $0x1f0] sm:$0xff]  ;;  %v97_v55 = vld [vmem:[%s3885_s3 + $0x218] sm:$0xff]  ;;  %v3067_v58 = vpack.c.bf16 %v98_v43, %v94_v42 }
  0x19   :  { %v101_v56 = vld [vmem:[%s3885_s3 + $0x238] sm:$0xff]  ;;  %v3070_v59 = vpack.c.bf16 %v107_v49, %v103_v46  ;;  %v102_v60 = vld [vmem:[%s3885_s3 + $0x240] sm:$0xff]  ;;  %v111_v0 = vld [vmem:[%s3885_s3 + $0x288] sm:$0xff]  ;;  %v3082_v1 = vpack.c.bf16 %v92_v53, %v88_v52 }
  0x1a   :  { %1594 = vmatpush1.bf16.msra.mxu0 %v2959_v5  ;;  %v106_v62 = vld [vmem:[%s3885_s3 + $0x260] sm:$0xff]  ;;  %v115_v2 = vld [vmem:[%s3885_s3 + $0x2a8] sm:$0xff]  ;;  %v3088_v4 = vpack.c.bf16 %v101_v56, %v97_v55  ;;  %v96_v9 = vld [vmem:[%s3885_s3 + $0x210] sm:$0xff] }
  0x1b   :  { %1596 = vmatprep.subr.bf16.mxu0 %v2962_v6  ;;  %1658 = vmatpush1.bf16.msra.mxu1 %v3010_v30  ;;  %v100_v10 = vld [vmem:[%s3885_s3 + $0x230] sm:$0xff]  ;;  %v105_v11 = vld [vmem:[%s3885_s3 + $0x258] sm:$0xff]  ;;  %v3103_v17 = vpack.c.bf16 %v106_v62, %v102_v60  ;;  %v110_v18 = vld [vmem:[%s3885_s3 + $0x280] sm:$0xff]  ;;  %v3109_v19 = vpack.c.bf16 %v115_v2, %v111_v0 }
  0x1c   :  { %1660 = vmatprep.subr.bf16.mxu1 %v3016_v33  ;;  %v109_v14 = vld [vmem:[%s3885_s3 + $0x278] sm:$0xff]  ;;  %v114_v20 = vld [vmem:[%s3885_s3 + $0x2a0] sm:$0xff]  ;;  %v119_v26 = vld [vmem:[%s3885_s3 + $0x2c8] sm:$0xff]  ;;  %v3121_v28 = vpack.c.bf16 %v100_v10, %v96_v9 }
  0x1d   :  { %v123_v27 = vld [vmem:[%s3885_s3 + $0x2e8] sm:$0xff]  ;;  %v3124_v31 = vpack.c.bf16 %v109_v14, %v105_v11  ;;  %v104_v34 = vld [vmem:[%s3885_s3 + $0x250] sm:$0xff]  ;;  %v26_v37 = vld [vmem:[%s3886_s1] sm:$0xff]  ;;  %v3142_v43 = vpack.c.bf16 %v114_v20, %v110_v18 }
  0x1e   :  { %1598 = vmatpush1.bf16.msra.mxu0 %v2995_v22  ;;  %v108_v35 = vld [vmem:[%s3885_s3 + $0x270] sm:$0xff]  ;;  %v113_v38 = vld [vmem:[%s3885_s3 + $0x298] sm:$0xff]  ;;  %247 = vmatprep.mubr.f32.mxu0 %v26_v37  ;;  %v3145_v46 = vpack.c.bf16 %v123_v27, %v119_v26  ;;  %v118_v49 = vld [vmem:[%s3885_s3 + $0x2c0] sm:$0xff] }
  0x1f   :  { %1600 = vmatprep.subr.bf16.mxu0 %v2998_v23  ;;  %1662 = vmatpush1.bf16.msra.mxu1 %v3046_v48  ;;  %v117_v42 = vld [vmem:[%s3885_s3 + $0x2b8] sm:$0xff]  ;;  %v122_v52 = vld [vmem:[%s3885_s3 + $0x2e0] sm:$0xff]  ;;  %v127_v53 = vld [vmem:[%s3885_s3 + $0x308] sm:$0xff]  ;;  %v3157_v55 = vpack.c.bf16 %v108_v35, %v104_v34 }
  0x20   :  { %1664 = vmatprep.subr.bf16.mxu1 %v3052_v50  ;;  %318 = vmatprep.mubr.f32.mxu1 %v26_v37  ;;  %v131_v56 = vld [vmem:[%s3885_s3 + $0x328] sm:$0xff]  ;;  %v3163_v60 = vpack.c.bf16 %v117_v42, %v113_v38  ;;  %v112_v62 = vld [vmem:[%s3885_s3 + $0x290] sm:$0xff]  ;;  %v121_v2 = vld [vmem:[%s3885_s3 + $0x2d8] sm:$0xff]  ;;  %v3178_v10 = vpack.c.bf16 %v122_v52, %v118_v49 }
  0x21   :  { %v116_v0 = vld [vmem:[%s3885_s3 + $0x2b0] sm:$0xff]  ;;  %v125_v9 = vld [vmem:[%s3885_s3 + $0x2f8] sm:$0xff]  ;;  %v3181_v11 = vpack.c.bf16 %v131_v56, %v127_v53  ;;  %v126_v14 = vld [vmem:[%s3885_s3 + $0x300] sm:$0xff] }
  0x22   :  { %1602 = vmatpush1.bf16.msra.mxu0 %v3031_v39  ;;  %3938 = vst [vmem:[#allocation6_spill] sm:$0xff] %v3178_v10  ;;  %v130_v18 = vld [vmem:[%s3885_s3 + $0x320] sm:$0xff]  ;;  %v135_v20 = vld [vmem:[%s3885_s3 + $0x348] sm:$0xff]  ;;  %v3193_v26 = vpack.c.bf16 %v116_v0, %v112_v62  ;;  %v3199_v34 = vpack.c.bf16 %v125_v9, %v121_v2  ;;  %v120_v35 = vld [vmem:[%s3885_s3 + $0x2d0] sm:$0xff] }
  0x23   :  { %1604 = vmatprep.subr.bf16.mxu0 %v3034_v40  ;;  %1666 = vmatpush1.bf16.msra.mxu1 %v3082_v1  ;;  %3939 = vst [vmem:[#allocation7_spill] sm:$0xff] %v3181_v11  ;;  %v139_v27 = vld [vmem:[%s3885_s3 + $0x368] sm:$0xff]  ;;  %v124_v37 = vld [vmem:[%s3885_s3 + $0x2f0] sm:$0xff]  ;;  %v129_v38 = vld [vmem:[%s3885_s3 + $0x318] sm:$0xff]  ;;  %v3214_v49 = vpack.c.bf16 %v130_v18, %v126_v14 }
  0x24   :  { %1668 = vmatprep.subr.bf16.mxu1 %v3088_v4  ;;  %3940 = vst [vmem:[#allocation8_spill] sm:$0xff] %v3199_v34  ;;  %v133_v42 = vld [vmem:[%s3885_s3 + $0x338] sm:$0xff]  ;;  %v3217_v52 = vpack.c.bf16 %v139_v27, %v135_v20  ;;  %v134_v53 = vld [vmem:[%s3885_s3 + $0x340] sm:$0xff]  ;;  %v143_v62 = vld [vmem:[%s3885_s3 + $0x388] sm:$0xff]  ;;  %v3229_v0 = vpack.c.bf16 %v124_v37, %v120_v35 }
  0x25   :  { %3941 = vst [vmem:[#allocation9_spill] sm:$0xff] %v3214_v49  ;;  %v138_v56 = vld [vmem:[%s3885_s3 + $0x360] sm:$0xff]  ;;  %v147_v2 = vld [vmem:[%s3885_s3 + $0x3a8] sm:$0xff]  ;;  %v3235_v9 = vpack.c.bf16 %v133_v42, %v129_v38  ;;  %v128_v14 = vld [vmem:[%s3885_s3 + $0x310] sm:$0xff] }
  0x26   :  { %1606 = vmatpush1.bf16.msra.mxu0 %v3067_v58  ;;  %3942 = vst [vmem:[#allocation10_spill] sm:$0xff] %v3217_v52  ;;  %3943 = vst [vmem:[#allocation11_spill] sm:$0xff] %v3229_v0  ;;  %v132_v18 = vld [vmem:[%s3885_s3 + $0x330] sm:$0xff]  ;;  %v137_v20 = vld [vmem:[%s3885_s3 + $0x358] sm:$0xff]  ;;  %v3250_v35 = vpack.c.bf16 %v138_v56, %v134_v53  ;;  %v3253_v37 = vpack.c.bf16 %v147_v2, %v143_v62 }
  0x27   :  { %1608 = vmatprep.subr.bf16.mxu0 %v3070_v59  ;;  %1670 = vmatpush1.bf16.msra.mxu1 %v3121_v28  ;;  %3944 = vst [vmem:[#allocation12_spill] sm:$0xff] %v3235_v9  ;;  %v141_v27 = vld [vmem:[%s3885_s3 + $0x378] sm:$0xff]  ;;  %v142_v38 = vld [vmem:[%s3885_s3 + $0x380] sm:$0xff]  ;;  %v3265_v53 = vpack.c.bf16 %v132_v18, %v128_v14  ;;  %v155_v56 = vld [vmem:[%s3885_s3 + $0x3e8] sm:$0xff] }
  0x28   :  { %1672 = vmatprep.subr.bf16.mxu1 %v3124_v31  ;;  %3945 = vst [vmem:[#allocation13_spill] sm:$0xff] %v3250_v35  ;;  %3946 = vst [vmem:[#allocation14_spill] sm:$0xff] %v3253_v37  ;;  %v146_v42 = vld [vmem:[%s3885_s3 + $0x3a0] sm:$0xff]  ;;  %v3271_v62 = vpack.c.bf16 %v141_v27, %v137_v20  ;;  %v136_v2 = vld [vmem:[%s3885_s3 + $0x350] sm:$0xff] }
  0x29   :  { %3947 = vst [vmem:[#allocation15_spill] sm:$0xff] %v3265_v53  ;;  %v145_v14 = vld [vmem:[%s3885_s3 + $0x398] sm:$0xff]  ;;  %v3286_v20 = vpack.c.bf16 %v146_v42, %v142_v38  ;;  %v148_v42 = vld [vmem:[%s3885_s3 + $0x3b0] sm:$0xff] }
  0x2a   :  { %1610 = vmatpush1.bf16.msra.mxu0 %v3103_v17  ;;  %3948 = vst [vmem:[#allocation16_spill] sm:$0xff] %v3271_v62  ;;  %v149_v18 = vld [vmem:[%s3885_s3 + $0x3b8] sm:$0xff] }
  0x2b   :  { %1612 = vmatprep.subr.bf16.mxu0 %v3109_v19  ;;  %1674 = vmatpush1.bf16.msra.mxu1 %v3157_v55  ;;  %3949 = vst [vmem:[#allocation17_spill] sm:$0xff] %v3286_v20  ;;  %v3301_v38 = vpack.c.bf16 %v149_v18, %v145_v14 }
  0x2c   :  { %1676 = vmatprep.subr.bf16.mxu1 %v3163_v60 }
  0x2d   :  { %3952 = vst [vmem:[#allocation20_spill] sm:$0xff] %v3301_v38 }
  0x2e   :  { %1614 = vmatpush1.bf16.msra.mxu0 %v3142_v43 }
  0x2f   :  { %1616 = vmatprep.subr.bf16.mxu0 %v3145_v46  ;;  %1678 = vmatpush1.bf16.msra.mxu1 %v3193_v26 }
  0x30   :  { %1680 = vmatprep.subr.bf16.mxu1 %v3199_v34 }
  0x32   :  { %1618 = vmatpush1.bf16.msra.mxu0 %v3178_v10 }
  0x33   :  { %1620 = vmatprep.subr.bf16.mxu0 %v3181_v11  ;;  %1682 = vmatpush1.bf16.msra.mxu1 %v3229_v0  ;;  %v140_v0 = vld [vmem:[%s3885_s3 + $0x370] sm:$0xff] }
  0x34   :  { %1684 = vmatprep.subr.bf16.mxu1 %v3235_v9  ;;  %v150_v9 = vld [vmem:[%s3885_s3 + $0x3c0] sm:$0xff]  ;;  %v3298_v34 = vpack.c.bf16 %v140_v0, %v136_v2  ;;  %v157_v0 = vld [vmem:[%s3885_s3 + $0x3f8] sm:$0xff] }
  0x36   :  { %1622 = vmatpush1.bf16.msra.mxu0 %v3214_v49  ;;  %v151_v49 = vld [vmem:[%s3885_s3 + $0x3c8] sm:$0xff]  ;;  %3951 = vst [vmem:[#allocation19_spill] sm:$0xff] %v3298_v34 }
  0x37   :  { %1624 = vmatprep.subr.bf16.mxu0 %v3217_v52  ;;  %v3289_v27 = vpack.c.bf16 %v155_v56, %v151_v49  ;;  %v154_v52 = vld [vmem:[%s3885_s3 + $0x3e0] sm:$0xff]  ;;  %1686 = vmatpush1.bf16.msra.mxu1 %v3265_v53  ;;  %v144_v49 = vld [vmem:[%s3885_s3 + $0x390] sm:$0xff]  ;;  %v153_v56 = vld [vmem:[%s3885_s3 + $0x3d8] sm:$0xff] }
  0x38   :  { %1688 = vmatprep.subr.bf16.mxu1 %v3271_v62  ;;  %v3316_v2 = vpack.c.bf16 %v154_v52, %v150_v9  ;;  %v3320_v14 = vpack.c.bf16 %v148_v42, %v144_v49  ;;  %v3323_v18 = vpack.c.bf16 %v157_v0, %v153_v56  ;;  %v152_v62 = vld [vmem:[%s3885_s3 + $0x3d0] sm:$0xff]  ;;  %v182_v52 = vld [vmem:[%s3887_s0] sm:$0xff]  ;;  %v3960_v42 = vld [vmem:[#allocation11_spill] sm:$0xff] }
  0x39   :  { %3950 = vst [vmem:[#allocation18_spill] sm:$0xff] %v3289_v27  ;;  %v3959_v49 = vld [vmem:[#allocation10_spill] sm:$0xff]  ;;  %v3961_v56 = vld [vmem:[#allocation12_spill] sm:$0xff] }
  0x3a   :  { %1626 = vmatpush1.bf16.msra.mxu0 %v3250_v35  ;;  %3953 = vst [vmem:[#allocation21_spill] sm:$0xff] %v3316_v2  ;;  %3954 = vst [vmem:[#allocation22_spill] sm:$0xff] %v3320_v14  ;;  %v3962_v0 = vld [vmem:[#allocation16_spill] sm:$0xff] }
  0x3b   :  { %1628 = vmatprep.subr.bf16.mxu0 %v3253_v37  ;;  %1690 = vmatpush1.bf16.msra.mxu1 %v3298_v34  ;;  %3955 = vst [vmem:[#allocation23_spill] sm:$0xff] %v3323_v18 }
  0x3c   :  { %1692 = vmatprep.subr.bf16.mxu1 %v3301_v38 }
  0x3e   :  { %1630 = vmatpush1.bf16.msra.mxu0 %v3286_v20  ;;  %v156_v20 = vld [vmem:[%s3885_s3 + $0x3f0] sm:$0xff] }
  0x3f   :  { %1632 = vmatprep.subr.bf16.mxu0 %v3289_v27  ;;  %1694 = vmatpush1.bf16.msra.mxu1 %v3320_v14  ;;  %v3336_v9 = vpack.c.bf16 %v156_v20, %v152_v62  ;;  %v3957_v62 = vld [vmem:[#allocation8_spill] sm:$0xff]  ;;  %v3958_v20 = vld [vmem:[#allocation9_spill] sm:$0xff] }
  0x40   :  { %1696 = vmatprep.subr.bf16.mxu1 %v3323_v18 }
  0x41   :  { %3956 = vst [vmem:[#allocation24_spill] sm:$0xff] %v3336_v9 }
  0x42   :  { %1634 = vmatpush1.bf16.msra.mxu0 %v3316_v2 }
  0x43   :  { %1700 = vmatprep.subr.bf16.mxu0 %v2767_v3  ;;  %1698 = vmatpush1.bf16.msra.mxu1 %v3336_v9 }
  0x44   :  { %1764 = vmatprep.subr.bf16.mxu1 %v2819_v21 }
  0x45   :  { %248 = vmatmul.mubr.f32.vlgmr.msra.gmra.mrb[0].mxu0 %v182_v52 }
  0x46   :  { %1702 = vmatpush1.bf16.msra.mxu0 %v2778_v7  ;;  %319 = vmatmul.mubr.f32.vlgmr.msra.gmra.mrb[0].mxu1 %v182_v52  ;;  %v3963_v52 = vld [vmem:[#allocation17_spill] sm:$0xff] }
  0x47   :  { %1704 = vmatprep.subr.bf16.mxu0 %v2780_v8  ;;  %1766 = vmatpush1.bf16.msra.mxu1 %v2827_v24 }
  0x48   :  { %1768 = vmatprep.subr.bf16.mxu1 %v2852_v32 }
  0x4a   :  { %1706 = vmatpush1.bf16.msra.mxu0 %v2796_v13 }
  0x4b   :  { %1708 = vmatprep.subr.bf16.mxu0 %v2805_v16  ;;  %1770 = vmatpush1.bf16.msra.mxu1 %v2863_v36 }
  0x4c   :  { %1772 = vmatprep.subr.bf16.mxu1 %v2887_v44 }
  0x4e   :  { %1710 = vmatpush1.bf16.msra.mxu0 %v2830_v25 }
  0x4f   :  { %1712 = vmatprep.subr.bf16.mxu0 %v2843_v29  ;;  %1774 = vmatpush1.bf16.msra.mxu1 %v2896_v47 }
  0x50   :  { %1776 = vmatprep.subr.bf16.mxu1 %v2908_v51 }
  0x52   :  { %1714 = vmatpush1.bf16.msra.mxu0 %v2879_v41 }
  0x53   :  { %1716 = vmatprep.subr.bf16.mxu0 %v2890_v45  ;;  %1778 = vmatpush1.bf16.msra.mxu1 %v2938_v61 }
  0x54   :  { %1780 = vmatprep.subr.bf16.mxu1 %v2944_v63 }
  0x56   :  { %1718 = vmatpush1.bf16.msra.mxu0 %v2917_v54 }
  0x57   :  { %1720 = vmatprep.subr.bf16.mxu0 %v2926_v57  ;;  %1782 = vmatpush1.bf16.msra.mxu1 %v2974_v12 }
  0x58   :  { %1784 = vmatprep.subr.bf16.mxu1 %v2980_v15 }
  0x5a   :  { %1722 = vmatpush1.bf16.msra.mxu0 %v2959_v5 }
  0x5b   :  { %1724 = vmatprep.subr.bf16.mxu0 %v2962_v6  ;;  %1786 = vmatpush1.bf16.msra.mxu1 %v3010_v30 }
  0x5c   :  { %1788 = vmatprep.subr.bf16.mxu1 %v3016_v33 }
  0x5e   :  { %1726 = vmatpush1.bf16.msra.mxu0 %v2995_v22 }
  0x5f   :  { %1728 = vmatprep.subr.bf16.mxu0 %v2998_v23  ;;  %1790 = vmatpush1.bf16.msra.mxu1 %v3046_v48 }
  0x60   :  { %1792 = vmatprep.subr.bf16.mxu1 %v3052_v50 }
  0x62   :  { %1730 = vmatpush1.bf16.msra.mxu0 %v3031_v39 }
  0x63   :  { %1732 = vmatprep.subr.bf16.mxu0 %v3034_v40  ;;  %1794 = vmatpush1.bf16.msra.mxu1 %v3082_v1 }
  0x64   :  { %1796 = vmatprep.subr.bf16.mxu1 %v3088_v4 }
  0x66   :  { %1734 = vmatpush1.bf16.msra.mxu0 %v3067_v58 }
  0x67   :  { %1736 = vmatprep.subr.bf16.mxu0 %v3070_v59  ;;  %1798 = vmatpush1.bf16.msra.mxu1 %v3121_v28 }
  0x68   :  { %1800 = vmatprep.subr.bf16.mxu1 %v3124_v31 }
  0x6a   :  { %1738 = vmatpush1.bf16.msra.mxu0 %v3103_v17 }
  0x6b   :  { %1740 = vmatprep.subr.bf16.mxu0 %v3109_v19  ;;  %1802 = vmatpush1.bf16.msra.mxu1 %v3157_v55 }
  0x6c   :  { %1804 = vmatprep.subr.bf16.mxu1 %v3163_v60 }
  0x6e   :  { %1742 = vmatpush1.bf16.msra.mxu0 %v3142_v43 }
  0x6f   :  { %1744 = vmatprep.subr.bf16.mxu0 %v3145_v46  ;;  %1806 = vmatpush1.bf16.msra.mxu1 %v3193_v26 }
  0x70   :  { %1808 = vmatprep.subr.bf16.mxu1 %v3957_v62 }
  0x72   :  { %1746 = vmatpush1.bf16.msra.mxu0 %v3178_v10 }
  0x73   :  { %1748 = vmatprep.subr.bf16.mxu0 %v3181_v11  ;;  %1810 = vmatpush1.bf16.msra.mxu1 %v3960_v42 }
  0x74   :  { %1812 = vmatprep.subr.bf16.mxu1 %v3961_v56 }
  0x76   :  { %1750 = vmatpush1.bf16.msra.mxu0 %v3958_v20 }
  0x77   :  { %1752 = vmatprep.subr.bf16.mxu0 %v3959_v49  ;;  %1814 = vmatpush1.bf16.msra.mxu1 %v3265_v53 }
  0x78   :  { %1816 = vmatprep.subr.bf16.mxu1 %v3962_v0 }
  0x7a   :  { %1754 = vmatpush1.bf16.msra.mxu0 %v3250_v35 }
  0x7b   :  { %1756 = vmatprep.subr.bf16.mxu0 %v3253_v37  ;;  %1818 = vmatpush1.bf16.msra.mxu1 %v3298_v34  ;;  %v160_v37 = vlaneseq }
  0x7c   :  { %1820 = vmatprep.subr.bf16.mxu1 %v3301_v38 }
  0x7e   :  { %1758 = vmatpush1.bf16.msra.mxu0 %v3963_v52  ;;  %v161_v52 = vshrl.u32 %v160_v37, 7 }
  0x7f   :  { %1760 = vmatprep.subr.bf16.mxu0 %v3289_v27  ;;  %1822 = vmatpush1.bf16.msra.mxu1 %v3320_v14  ;;  %v158_v27 = vld [vmem:[%s3888_s4] sm:$0xf] }
  0x80   :  { %1824 = vmatprep.subr.bf16.mxu1 %v3323_v18  ;;  %v162_v35 = vsub.s32 0, %v161_v52  ;;  %v166_v38 = vsub.s32 1, %v161_v52  ;;  %v174_v14 = vsub.s32 3, %v161_v52  ;;  %v170_v53 = vsub.s32 2, %v161_v52 }
  0x82   :  { %1762 = vmatpush1.bf16.msra.mxu0 %v3316_v2  ;;  %v3409_v34 = vrot.slane %v158_v27, %v162_v35  ;;  %v3411_v2 = vrot.slane %v158_v27, %v166_v38  ;;  %v3415_v49 = vrot.slane %v158_v27, %v174_v14  ;;  %v3418_v38 = vrot.slane %v158_v27, %v170_v53 }
  0x83   :  { %1828 = vmatprep.subr.bf16.mxu0 %v2767_v3  ;;  %1826 = vmatpush1.bf16.msra.mxu1 %v3336_v9 }
  0x84   :  { %1892 = vmatprep.subr.bf16.mxu1 %v2819_v21  ;;  %3964 = vst [vmem:[#allocation8_spill] sm:$0xff] %v3409_v34 }
 0x118   :  { %v249_v3 = vpop.f32.mrb[0].mxu0 }
 0x119   :  { %v250_v18 = vadd.f32 %v249_v3, %v3409_v34  ;;  %v251_v0 = vpop.f32.mrb[1].mxu0  ;;  %v320_v20 = vpop.f32.mrb[0].mxu1 }
 0x11a   :  { %v252_v9 = vadd.f32 %v251_v0, %v3411_v2  ;;  %v322_v56 = vpop.f32.mrb[1].mxu1  ;;  %v321_v42 = vadd.f32 %v320_v20, %v3418_v38 }
 0x11b   :  { %v1540_v21 = vmul.f32 -1.442695, %v250_v18  ;;  %v323_v35 = vadd.f32 %v322_v56, %v3415_v49 }
 0x11c   :  { %v1541_v37 = vmul.f32 -1.442695, %v252_v9  ;;  %v28_v9 = vld [vmem:[%s3889_s2] sm:$0xff] }
 0x11d   :  { %2595 = vpow2.f32 %v1540_v21  ;;  %v1542_v11 = vmul.f32 -1.442695, %v323_v35  ;;  %v1543_v35 = vld [vmem:[%s3887_s0 + $0x8] sm:$0xff] }
 0x11e   :  { %2597 = vpow2.f32 %v1541_v37 }
 0x11f   :  { %2599 = vpow2.f32 %v1542_v11 }
 0x120   :  { %2601 = vtanh.f32 %v321_v42 }
 0x127   :  { %v2596_v3 = vpop.eup %2595 }
 0x128   :  { %v2598_v34 = vpop.eup %2597  ;;  %v328_v0 = vadd.f32 1.0, %v2596_v3  ;;  %v3965_v3 = vld [vmem:[#allocation11_spill] sm:$0xff] }
 0x129   :  { %v334_v14 = vadd.f32 1.0, %v2598_v34  ;;  %v2600_v18 = vpop.eup %2599 }
 0x12a   :  { %2603 = vrcp.f32 %v328_v0  ;;  %v2602_v21 = vpop.eup %2601  ;;  %v341_v53 = vadd.f32 1.0, %v2600_v18  ;;  %v3966_v0 = vld [vmem:[#allocation7_spill] sm:$0xff]  ;;  %v3968_v18 = vld [vmem:[#allocation9_spill] sm:$0xff] }
 0x12b   :  { %2605 = vrcp.f32 %v334_v14  ;;  %v3967_v14 = vld [vmem:[#allocation12_spill] sm:$0xff] }
 0x12c   :  { %2607 = vrcp.f32 %v341_v53  ;;  %v3972_v53 = vld [vmem:[#allocation13_spill] sm:$0xff] }
 0x134   :  { %v2604_v56 = vpop.eup %2603 }
 0x135   :  { %v2606_v27 = vpop.eup %2605  ;;  %v345_v52 = vmul.f32 %v2604_v56, %v2602_v21  ;;  %v3969_v21 = vld [vmem:[#allocation15_spill] sm:$0xff]  ;;  %v3971_v56 = vld [vmem:[#allocation16_spill] sm:$0xff] }
 0x136   :  { %v344_v37 = vmul.f32 %v2606_v27, %v28_v9  ;;  %v2608_v11 = vpop.eup %2607  ;;  %v3970_v9 = vld [vmem:[#allocation10_spill] sm:$0xff]  ;;  %v3973_v27 = vld [vmem:[#allocation19_spill] sm:$0xff] }
 0x138   :  { %v3424_v20 = vadd.f32 %v345_v52, %v344_v37  ;;  %v3974_v52 = vld [vmem:[#allocation14_spill] sm:$0xff]  ;;  %v3975_v37 = vld [vmem:[#allocation20_spill] sm:$0xff] }
 0x13a   :  { %2609 = vtanh.f32 %v3424_v20 }
 0x144   :  { %v2610_v34 = vpop.eup %2609 }
 0x145   :  { %v348_v42 = vmul.f32 %v2610_v34, %v2608_v11  ;;  %v3976_v11 = vld [vmem:[#allocation17_spill] sm:$0xff]  ;;  %v3977_v34 = vld [vmem:[#allocation22_spill] sm:$0xff] }
 0x147   :  { %415 = vmatprep.mubr.f32.mxu0 %v348_v42  ;;  %486 = vmatprep.mubr.f32.mxu1 %v348_v42  ;;  %v3978_v42 = vld [vmem:[#allocation18_spill] sm:$0xff] }
 0x148   :  { %416 = vmatmul.mubr.f32.vlgmr.msra.gmra.mrb[2].mxu0 %v1543_v35  ;;  %487 = vmatmul.mubr.f32.vlgmr.msra.gmra.mrb[2].mxu1 %v1543_v35  ;;  %v3979_v35 = vld [vmem:[#allocation23_spill] sm:$0xff] }
 0x149   :  { %1830 = vmatpush1.bf16.msra.mxu0 %v2778_v7  ;;  %1894 = vmatpush1.bf16.msra.mxu1 %v2827_v24 }
 0x14a   :  { %1832 = vmatprep.subr.bf16.mxu0 %v2780_v8  ;;  %1896 = vmatprep.subr.bf16.mxu1 %v2852_v32 }
 0x14d   :  { %1834 = vmatpush1.bf16.msra.mxu0 %v2796_v13  ;;  %1898 = vmatpush1.bf16.msra.mxu1 %v2863_v36 }
 0x14e   :  { %1836 = vmatprep.subr.bf16.mxu0 %v2805_v16  ;;  %1900 = vmatprep.subr.bf16.mxu1 %v2887_v44 }
 0x151   :  { %1838 = vmatpush1.bf16.msra.mxu0 %v2830_v25  ;;  %1902 = vmatpush1.bf16.msra.mxu1 %v2896_v47 }
 0x152   :  { %1840 = vmatprep.subr.bf16.mxu0 %v2843_v29  ;;  %1904 = vmatprep.subr.bf16.mxu1 %v2908_v51 }
 0x155   :  { %1842 = vmatpush1.bf16.msra.mxu0 %v2879_v41  ;;  %1906 = vmatpush1.bf16.msra.mxu1 %v2938_v61 }
 0x156   :  { %1844 = vmatprep.subr.bf16.mxu0 %v2890_v45  ;;  %1908 = vmatprep.subr.bf16.mxu1 %v2944_v63 }
 0x159   :  { %1846 = vmatpush1.bf16.msra.mxu0 %v2917_v54  ;;  %1910 = vmatpush1.bf16.msra.mxu1 %v2974_v12 }
 0x15a   :  { %1848 = vmatprep.subr.bf16.mxu0 %v2926_v57  ;;  %1912 = vmatprep.subr.bf16.mxu1 %v2980_v15 }
 0x15d   :  { %1850 = vmatpush1.bf16.msra.mxu0 %v2959_v5  ;;  %1914 = vmatpush1.bf16.msra.mxu1 %v3010_v30 }
 0x15e   :  { %1852 = vmatprep.subr.bf16.mxu0 %v2962_v6  ;;  %1916 = vmatprep.subr.bf16.mxu1 %v3016_v33 }
 0x161   :  { %1854 = vmatpush1.bf16.msra.mxu0 %v2995_v22  ;;  %1918 = vmatpush1.bf16.msra.mxu1 %v3046_v48 }
 0x162   :  { %1856 = vmatprep.subr.bf16.mxu0 %v2998_v23  ;;  %1920 = vmatprep.subr.bf16.mxu1 %v3052_v50 }
 0x165   :  { %1858 = vmatpush1.bf16.msra.mxu0 %v3031_v39  ;;  %1922 = vmatpush1.bf16.msra.mxu1 %v3082_v1 }
 0x166   :  { %1860 = vmatprep.subr.bf16.mxu0 %v3034_v40  ;;  %1924 = vmatprep.subr.bf16.mxu1 %v3088_v4 }
 0x169   :  { %1862 = vmatpush1.bf16.msra.mxu0 %v3067_v58  ;;  %1926 = vmatpush1.bf16.msra.mxu1 %v3121_v28 }
 0x16a   :  { %1864 = vmatprep.subr.bf16.mxu0 %v3070_v59  ;;  %1928 = vmatprep.subr.bf16.mxu1 %v3124_v31 }
 0x16d   :  { %1866 = vmatpush1.bf16.msra.mxu0 %v3103_v17  ;;  %1930 = vmatpush1.bf16.msra.mxu1 %v3157_v55 }
 0x16e   :  { %1868 = vmatprep.subr.bf16.mxu0 %v3109_v19  ;;  %1932 = vmatprep.subr.bf16.mxu1 %v3163_v60 }
 0x171   :  { %1870 = vmatpush1.bf16.msra.mxu0 %v3142_v43  ;;  %1934 = vmatpush1.bf16.msra.mxu1 %v3193_v26 }
 0x172   :  { %1872 = vmatprep.subr.bf16.mxu0 %v3145_v46  ;;  %1936 = vmatprep.subr.bf16.mxu1 %v3957_v62 }
 0x175   :  { %1874 = vmatpush1.bf16.msra.mxu0 %v3178_v10  ;;  %1938 = vmatpush1.bf16.msra.mxu1 %v3965_v3 }
 0x176   :  { %1876 = vmatprep.subr.bf16.mxu0 %v3966_v0  ;;  %1940 = vmatprep.subr.bf16.mxu1 %v3967_v14 }
 0x179   :  { %1878 = vmatpush1.bf16.msra.mxu0 %v3968_v18  ;;  %1942 = vmatpush1.bf16.msra.mxu1 %v3969_v21  ;;  %v3980_v21 = vld [vmem:[#allocation21_spill] sm:$0xff]  ;;  %v3984_v18 = vld [vmem:[#allocation8_spill] sm:$0xff] }
 0x17a   :  { %1880 = vmatprep.subr.bf16.mxu0 %v3970_v9  ;;  %1944 = vmatprep.subr.bf16.mxu1 %v3971_v56  ;;  %v3981_v9 = vld [vmem:[#allocation24_spill] sm:$0xff] }
 0x17b   :  { %v3982_v56 = vld [vmem:[#allocation4_spill] sm:$0xff] }
 0x17d   :  { %1882 = vmatpush1.bf16.msra.mxu0 %v3972_v53  ;;  %1946 = vmatpush1.bf16.msra.mxu1 %v3973_v27  ;;  %v3983_v53 = vld [vmem:[#allocation5_spill] sm:$0xff] }
 0x17e   :  { %1884 = vmatprep.subr.bf16.mxu0 %v3974_v52  ;;  %1948 = vmatprep.subr.bf16.mxu1 %v3975_v37 }
 0x181   :  { %1886 = vmatpush1.bf16.msra.mxu0 %v3976_v11  ;;  %1950 = vmatpush1.bf16.msra.mxu1 %v3977_v34 }
 0x182   :  { %1888 = vmatprep.subr.bf16.mxu0 %v3978_v42  ;;  %1952 = vmatprep.subr.bf16.mxu1 %v3979_v35 }
 0x185   :  { %1890 = vmatpush1.bf16.msra.mxu0 %v3980_v21  ;;  %1954 = vmatpush1.bf16.msra.mxu1 %v3981_v9 }
 0x186   :  { %1956 = vmatprep.subr.bf16.mxu0 %v3982_v56  ;;  %2020 = vmatprep.subr.bf16.mxu1 %v3983_v53 }
 0x21b   :  { %v417_v27 = vpop.f32.mrb[2].mxu0  ;;  %v488_v52 = vpop.f32.mrb[2].mxu1 }
 0x21c   :  { %v418_v37 = vadd.f32 %v417_v27, %v3984_v18  ;;  %v419_v14 = vpop.f32.mrb[3].mxu0  ;;  %v490_v11 = vpop.f32.mrb[3].mxu1  ;;  %v489_v9 = vadd.f32 %v488_v52, %v3418_v38 }
 0x21d   :  { %v420_v34 = vadd.f32 %v419_v14, %v3411_v2  ;;  %v491_v21 = vadd.f32 %v490_v11, %v3415_v49 }
 0x21e   :  { %v1544_v0 = vmul.f32 -1.442695, %v418_v37 }
 0x21f   :  { %v1545_v42 = vmul.f32 -1.442695, %v420_v34  ;;  %v1546_v35 = vmul.f32 -1.442695, %v491_v21 }
 0x220   :  { %2611 = vpow2.f32 %v1544_v0 }
 0x221   :  { %2613 = vpow2.f32 %v1545_v42 }
 0x222   :  { %2615 = vpow2.f32 %v1546_v35  ;;  %v3990_v35 = vld [vmem:[#allocation15_spill] sm:$0xff] }
 0x223   :  { %2617 = vtanh.f32 %v489_v9  ;;  %v3988_v9 = vld [vmem:[#allocation12_spill] sm:$0xff] }
 0x22a   :  { %v2612_v56 = vpop.eup %2611 }
 0x22b   :  { %v2614_v53 = vpop.eup %2613  ;;  %v496_v3 = vadd.f32 1.0, %v2612_v56 }
 0x22c   :  { %v502_v10 = vadd.f32 1.0, %v2614_v53  ;;  %v2616_v27 = vpop.eup %2615  ;;  %v3989_v53 = vld [vmem:[#allocation9_spill] sm:$0xff] }
 0x22d   :  { %2619 = vrcp.f32 %v496_v3  ;;  %v2618_v18 = vpop.eup %2617  ;;  %v509_v37 = vadd.f32 1.0, %v2616_v27  ;;  %v3986_v3 = vld [vmem:[#allocation11_spill] sm:$0xff]  ;;  %v3991_v27 = vld [vmem:[#allocation10_spill] sm:$0xff] }
 0x22e   :  { %2621 = vrcp.f32 %v502_v10  ;;  %v1547_v10 = vld [vmem:[%s3887_s0 + $0x10] sm:$0xff] }
 0x22f   :  { %2623 = vrcp.f32 %v509_v37  ;;  %v3993_v37 = vld [vmem:[#allocation13_spill] sm:$0xff] }
 0x237   :  { %v2620_v14 = vpop.eup %2619 }
 0x238   :  { %v2622_v34 = vpop.eup %2621  ;;  %v513_v0 = vmul.f32 %v2620_v14, %v2618_v18  ;;  %v3987_v18 = vld [vmem:[#allocation7_spill] sm:$0xff]  ;;  %v3992_v14 = vld [vmem:[#allocation16_spill] sm:$0xff] }
 0x239   :  { %v512_v42 = vmul.f32 %v2622_v34, %v3424_v20  ;;  %v2624_v21 = vpop.eup %2623  ;;  %v3985_v20 = vld [vmem:[#allocation6_spill] sm:$0xff]  ;;  %v3994_v34 = vld [vmem:[#allocation19_spill] sm:$0xff] }
 0x23b   :  { %v3499_v11 = vadd.f32 %v513_v0, %v512_v42  ;;  %v3995_v0 = vld [vmem:[#allocation14_spill] sm:$0xff]  ;;  %v3996_v42 = vld [vmem:[#allocation20_spill] sm:$0xff] }
 0x23d   :  { %2625 = vtanh.f32 %v3499_v11 }
 0x247   :  { %v2626_v52 = vpop.eup %2625 }
 0x248   :  { %v516_v56 = vmul.f32 %v2626_v52, %v2624_v21  ;;  %v3997_v21 = vld [vmem:[#allocation17_spill] sm:$0xff]  ;;  %v3998_v52 = vld [vmem:[#allocation22_spill] sm:$0xff] }
 0x24a   :  { %583 = vmatprep.mubr.f32.mxu0 %v516_v56  ;;  %654 = vmatprep.mubr.f32.mxu1 %v516_v56  ;;  %v3999_v56 = vld [vmem:[#allocation18_spill] sm:$0xff] }
 0x24b   :  { %584 = vmatmul.mubr.f32.vlgmr.msra.gmra.mrb[4].mxu0 %v1547_v10  ;;  %655 = vmatmul.mubr.f32.vlgmr.msra.gmra.mrb[4].mxu1 %v1547_v10  ;;  %v4000_v10 = vld [vmem:[#allocation23_spill] sm:$0xff] }
 0x24c   :  { %1958 = vmatpush1.bf16.msra.mxu0 %v2778_v7  ;;  %2022 = vmatpush1.bf16.msra.mxu1 %v2827_v24 }
 0x24d   :  { %1960 = vmatprep.subr.bf16.mxu0 %v2780_v8  ;;  %2024 = vmatprep.subr.bf16.mxu1 %v2852_v32 }
 0x250   :  { %1962 = vmatpush1.bf16.msra.mxu0 %v2796_v13  ;;  %2026 = vmatpush1.bf16.msra.mxu1 %v2863_v36 }
 0x251   :  { %1964 = vmatprep.subr.bf16.mxu0 %v2805_v16  ;;  %2028 = vmatprep.subr.bf16.mxu1 %v2887_v44 }
 0x254   :  { %1966 = vmatpush1.bf16.msra.mxu0 %v2830_v25  ;;  %2030 = vmatpush1.bf16.msra.mxu1 %v2896_v47 }
 0x255   :  { %1968 = vmatprep.subr.bf16.mxu0 %v2843_v29  ;;  %2032 = vmatprep.subr.bf16.mxu1 %v2908_v51 }
 0x258   :  { %1970 = vmatpush1.bf16.msra.mxu0 %v2879_v41  ;;  %2034 = vmatpush1.bf16.msra.mxu1 %v2938_v61 }
 0x259   :  { %1972 = vmatprep.subr.bf16.mxu0 %v2890_v45  ;;  %2036 = vmatprep.subr.bf16.mxu1 %v2944_v63 }
 0x25c   :  { %1974 = vmatpush1.bf16.msra.mxu0 %v2917_v54  ;;  %2038 = vmatpush1.bf16.msra.mxu1 %v2974_v12 }
 0x25d   :  { %1976 = vmatprep.subr.bf16.mxu0 %v2926_v57  ;;  %2040 = vmatprep.subr.bf16.mxu1 %v2980_v15 }
 0x260   :  { %1978 = vmatpush1.bf16.msra.mxu0 %v2959_v5  ;;  %2042 = vmatpush1.bf16.msra.mxu1 %v3010_v30 }
 0x261   :  { %1980 = vmatprep.subr.bf16.mxu0 %v2962_v6  ;;  %2044 = vmatprep.subr.bf16.mxu1 %v3016_v33 }
 0x264   :  { %1982 = vmatpush1.bf16.msra.mxu0 %v2995_v22  ;;  %2046 = vmatpush1.bf16.msra.mxu1 %v3046_v48 }
 0x265   :  { %1984 = vmatprep.subr.bf16.mxu0 %v2998_v23  ;;  %2048 = vmatprep.subr.bf16.mxu1 %v3052_v50 }
 0x268   :  { %1986 = vmatpush1.bf16.msra.mxu0 %v3031_v39  ;;  %2050 = vmatpush1.bf16.msra.mxu1 %v3082_v1 }
 0x269   :  { %1988 = vmatprep.subr.bf16.mxu0 %v3034_v40  ;;  %2052 = vmatprep.subr.bf16.mxu1 %v3088_v4 }
 0x26c   :  { %1990 = vmatpush1.bf16.msra.mxu0 %v3067_v58  ;;  %2054 = vmatpush1.bf16.msra.mxu1 %v3121_v28 }
 0x26d   :  { %1992 = vmatprep.subr.bf16.mxu0 %v3070_v59  ;;  %2056 = vmatprep.subr.bf16.mxu1 %v3124_v31 }
 0x270   :  { %1994 = vmatpush1.bf16.msra.mxu0 %v3103_v17  ;;  %2058 = vmatpush1.bf16.msra.mxu1 %v3157_v55 }
 0x271   :  { %1996 = vmatprep.subr.bf16.mxu0 %v3109_v19  ;;  %2060 = vmatprep.subr.bf16.mxu1 %v3163_v60 }
 0x274   :  { %1998 = vmatpush1.bf16.msra.mxu0 %v3142_v43  ;;  %2062 = vmatpush1.bf16.msra.mxu1 %v3193_v26 }
 0x275   :  { %2000 = vmatprep.subr.bf16.mxu0 %v3145_v46  ;;  %2064 = vmatprep.subr.bf16.mxu1 %v3957_v62 }
 0x278   :  { %2002 = vmatpush1.bf16.msra.mxu0 %v3985_v20  ;;  %2066 = vmatpush1.bf16.msra.mxu1 %v3986_v3 }
 0x279   :  { %2004 = vmatprep.subr.bf16.mxu0 %v3987_v18  ;;  %2068 = vmatprep.subr.bf16.mxu1 %v3988_v9 }
 0x27c   :  { %2006 = vmatpush1.bf16.msra.mxu0 %v3989_v53  ;;  %2070 = vmatpush1.bf16.msra.mxu1 %v3990_v35  ;;  %v4001_v35 = vld [vmem:[#allocation21_spill] sm:$0xff]  ;;  %v4005_v53 = vld [vmem:[#allocation8_spill] sm:$0xff] }
 0x27d   :  { %2008 = vmatprep.subr.bf16.mxu0 %v3991_v27  ;;  %2072 = vmatprep.subr.bf16.mxu1 %v3992_v14  ;;  %v4002_v27 = vld [vmem:[#allocation24_spill] sm:$0xff] }
 0x27e   :  { %v4003_v14 = vld [vmem:[#allocation4_spill] sm:$0xff] }
 0x280   :  { %2010 = vmatpush1.bf16.msra.mxu0 %v3993_v37  ;;  %2074 = vmatpush1.bf16.msra.mxu1 %v3994_v34  ;;  %v4004_v37 = vld [vmem:[#allocation5_spill] sm:$0xff] }
 0x281   :  { %2012 = vmatprep.subr.bf16.mxu0 %v3995_v0  ;;  %2076 = vmatprep.subr.bf16.mxu1 %v3996_v42 }
 0x284   :  { %2014 = vmatpush1.bf16.msra.mxu0 %v3997_v21  ;;  %2078 = vmatpush1.bf16.msra.mxu1 %v3998_v52 }
 0x285   :  { %2016 = vmatprep.subr.bf16.mxu0 %v3999_v56  ;;  %2080 = vmatprep.subr.bf16.mxu1 %v4000_v10 }
 0x288   :  { %2018 = vmatpush1.bf16.msra.mxu0 %v4001_v35  ;;  %2082 = vmatpush1.bf16.msra.mxu1 %v4002_v27 }
 0x289   :  { %2084 = vmatprep.subr.bf16.mxu0 %v4003_v14  ;;  %2148 = vmatprep.subr.bf16.mxu1 %v4004_v37 }
 0x31e   :  { %v585_v34 = vpop.f32.mrb[4].mxu0  ;;  %v656_v0 = vpop.f32.mrb[4].mxu1 }
 0x31f   :  { %v586_v42 = vadd.f32 %v585_v34, %v4005_v53  ;;  %v587_v9 = vpop.f32.mrb[5].mxu0  ;;  %v658_v21 = vpop.f32.mrb[5].mxu1  ;;  %v657_v27 = vadd.f32 %v656_v0, %v3418_v38 }
 0x320   :  { %v588_v52 = vadd.f32 %v587_v9, %v3411_v2  ;;  %v659_v35 = vadd.f32 %v658_v21, %v3415_v49 }
 0x321   :  { %v1548_v18 = vmul.f32 -1.442695, %v586_v42 }
 0x322   :  { %v1549_v56 = vmul.f32 -1.442695, %v588_v52  ;;  %v1550_v10 = vmul.f32 -1.442695, %v659_v35 }
 0x323   :  { %2627 = vpow2.f32 %v1548_v18 }
 0x324   :  { %2629 = vpow2.f32 %v1549_v56 }
 0x325   :  { %2631 = vpow2.f32 %v1550_v10  ;;  %v4011_v10 = vld [vmem:[#allocation15_spill] sm:$0xff] }
 0x326   :  { %2633 = vtanh.f32 %v657_v27  ;;  %v4009_v27 = vld [vmem:[#allocation12_spill] sm:$0xff] }
 0x32d   :  { %v2628_v14 = vpop.eup %2627 }
 0x32e   :  { %v2630_v37 = vpop.eup %2629  ;;  %v664_v3 = vadd.f32 1.0, %v2628_v14 }
 0x32f   :  { %v670_v20 = vadd.f32 1.0, %v2630_v37  ;;  %v2632_v34 = vpop.eup %2631  ;;  %v4010_v37 = vld [vmem:[#allocation9_spill] sm:$0xff] }
 0x330   :  { %2635 = vrcp.f32 %v664_v3  ;;  %v2634_v53 = vpop.eup %2633  ;;  %v677_v42 = vadd.f32 1.0, %v2632_v34  ;;  %v4007_v3 = vld [vmem:[#allocation11_spill] sm:$0xff]  ;;  %v4012_v34 = vld [vmem:[#allocation10_spill] sm:$0xff] }
 0x331   :  { %2637 = vrcp.f32 %v670_v20  ;;  %v1551_v20 = vld [vmem:[%s3887_s0 + $0x18] sm:$0xff] }
 0x332   :  { %2639 = vrcp.f32 %v677_v42  ;;  %v4014_v42 = vld [vmem:[#allocation13_spill] sm:$0xff] }
 0x33a   :  { %v2636_v9 = vpop.eup %2635 }
 0x33b   :  { %v2638_v52 = vpop.eup %2637  ;;  %v681_v18 = vmul.f32 %v2636_v9, %v2634_v53  ;;  %v4008_v53 = vld [vmem:[#allocation7_spill] sm:$0xff]  ;;  %v4013_v9 = vld [vmem:[#allocation16_spill] sm:$0xff] }
 0x33c   :  { %v680_v56 = vmul.f32 %v2638_v52, %v3499_v11  ;;  %v2640_v35 = vpop.eup %2639  ;;  %v4006_v11 = vld [vmem:[#allocation6_spill] sm:$0xff]  ;;  %v4015_v52 = vld [vmem:[#allocation19_spill] sm:$0xff] }
 0x33e   :  { %v3574_v21 = vadd.f32 %v681_v18, %v680_v56  ;;  %v4016_v18 = vld [vmem:[#allocation14_spill] sm:$0xff]  ;;  %v4017_v56 = vld [vmem:[#allocation20_spill] sm:$0xff] }
 0x340   :  { %2641 = vtanh.f32 %v3574_v21 }
 0x34a   :  { %v2642_v0 = vpop.eup %2641 }
 0x34b   :  { %v684_v14 = vmul.f32 %v2642_v0, %v2640_v35  ;;  %v4018_v35 = vld [vmem:[#allocation17_spill] sm:$0xff]  ;;  %v4019_v0 = vld [vmem:[#allocation22_spill] sm:$0xff] }
 0x34d   :  { %751 = vmatprep.mubr.f32.mxu0 %v684_v14  ;;  %822 = vmatprep.mubr.f32.mxu1 %v684_v14  ;;  %v4020_v14 = vld [vmem:[#allocation18_spill] sm:$0xff] }
 0x34e   :  { %752 = vmatmul.mubr.f32.vlgmr.msra.gmra.mrb[6].mxu0 %v1551_v20  ;;  %823 = vmatmul.mubr.f32.vlgmr.msra.gmra.mrb[6].mxu1 %v1551_v20  ;;  %v4021_v20 = vld [vmem:[#allocation23_spill] sm:$0xff] }
 0x34f   :  { %2086 = vmatpush1.bf16.msra.mxu0 %v2778_v7  ;;  %2150 = vmatpush1.bf16.msra.mxu1 %v2827_v24 }
 0x350   :  { %2088 = vmatprep.subr.bf16.mxu0 %v2780_v8  ;;  %2152 = vmatprep.subr.bf16.mxu1 %v2852_v32 }
 0x353   :  { %2090 = vmatpush1.bf16.msra.mxu0 %v2796_v13  ;;  %2154 = vmatpush1.bf16.msra.mxu1 %v2863_v36 }
 0x354   :  { %2092 = vmatprep.subr.bf16.mxu0 %v2805_v16  ;;  %2156 = vmatprep.subr.bf16.mxu1 %v2887_v44 }
 0x357   :  { %2094 = vmatpush1.bf16.msra.mxu0 %v2830_v25  ;;  %2158 = vmatpush1.bf16.msra.mxu1 %v2896_v47 }
 0x358   :  { %2096 = vmatprep.subr.bf16.mxu0 %v2843_v29  ;;  %2160 = vmatprep.subr.bf16.mxu1 %v2908_v51 }
 0x35b   :  { %2098 = vmatpush1.bf16.msra.mxu0 %v2879_v41  ;;  %2162 = vmatpush1.bf16.msra.mxu1 %v2938_v61 }
 0x35c   :  { %2100 = vmatprep.subr.bf16.mxu0 %v2890_v45  ;;  %2164 = vmatprep.subr.bf16.mxu1 %v2944_v63 }
 0x35f   :  { %2102 = vmatpush1.bf16.msra.mxu0 %v2917_v54  ;;  %2166 = vmatpush1.bf16.msra.mxu1 %v2974_v12 }
 0x360   :  { %2104 = vmatprep.subr.bf16.mxu0 %v2926_v57  ;;  %2168 = vmatprep.subr.bf16.mxu1 %v2980_v15 }
 0x363   :  { %2106 = vmatpush1.bf16.msra.mxu0 %v2959_v5  ;;  %2170 = vmatpush1.bf16.msra.mxu1 %v3010_v30 }
 0x364   :  { %2108 = vmatprep.subr.bf16.mxu0 %v2962_v6  ;;  %2172 = vmatprep.subr.bf16.mxu1 %v3016_v33 }
 0x367   :  { %2110 = vmatpush1.bf16.msra.mxu0 %v2995_v22  ;;  %2174 = vmatpush1.bf16.msra.mxu1 %v3046_v48 }
 0x368   :  { %2112 = vmatprep.subr.bf16.mxu0 %v2998_v23  ;;  %2176 = vmatprep.subr.bf16.mxu1 %v3052_v50 }
 0x36b   :  { %2114 = vmatpush1.bf16.msra.mxu0 %v3031_v39  ;;  %2178 = vmatpush1.bf16.msra.mxu1 %v3082_v1 }
 0x36c   :  { %2116 = vmatprep.subr.bf16.mxu0 %v3034_v40  ;;  %2180 = vmatprep.subr.bf16.mxu1 %v3088_v4 }
 0x36f   :  { %2118 = vmatpush1.bf16.msra.mxu0 %v3067_v58  ;;  %2182 = vmatpush1.bf16.msra.mxu1 %v3121_v28 }
 0x370   :  { %2120 = vmatprep.subr.bf16.mxu0 %v3070_v59  ;;  %2184 = vmatprep.subr.bf16.mxu1 %v3124_v31 }
 0x373   :  { %2122 = vmatpush1.bf16.msra.mxu0 %v3103_v17  ;;  %2186 = vmatpush1.bf16.msra.mxu1 %v3157_v55 }
 0x374   :  { %2124 = vmatprep.subr.bf16.mxu0 %v3109_v19  ;;  %2188 = vmatprep.subr.bf16.mxu1 %v3163_v60 }
 0x377   :  { %2126 = vmatpush1.bf16.msra.mxu0 %v3142_v43  ;;  %2190 = vmatpush1.bf16.msra.mxu1 %v3193_v26 }
 0x378   :  { %2128 = vmatprep.subr.bf16.mxu0 %v3145_v46  ;;  %2192 = vmatprep.subr.bf16.mxu1 %v3957_v62 }
 0x37b   :  { %2130 = vmatpush1.bf16.msra.mxu0 %v4006_v11  ;;  %2194 = vmatpush1.bf16.msra.mxu1 %v4007_v3 }
 0x37c   :  { %2132 = vmatprep.subr.bf16.mxu0 %v4008_v53  ;;  %2196 = vmatprep.subr.bf16.mxu1 %v4009_v27 }
 0x37f   :  { %2134 = vmatpush1.bf16.msra.mxu0 %v4010_v37  ;;  %2198 = vmatpush1.bf16.msra.mxu1 %v4011_v10  ;;  %v4022_v10 = vld [vmem:[#allocation21_spill] sm:$0xff]  ;;  %v4026_v37 = vld [vmem:[#allocation8_spill] sm:$0xff] }
 0x380   :  { %2136 = vmatprep.subr.bf16.mxu0 %v4012_v34  ;;  %2200 = vmatprep.subr.bf16.mxu1 %v4013_v9  ;;  %v4023_v34 = vld [vmem:[#allocation24_spill] sm:$0xff] }
 0x381   :  { %v4024_v9 = vld [vmem:[#allocation4_spill] sm:$0xff] }
 0x383   :  { %2138 = vmatpush1.bf16.msra.mxu0 %v4014_v42  ;;  %2202 = vmatpush1.bf16.msra.mxu1 %v4015_v52  ;;  %v4025_v42 = vld [vmem:[#allocation5_spill] sm:$0xff] }
 0x384   :  { %2140 = vmatprep.subr.bf16.mxu0 %v4016_v18  ;;  %2204 = vmatprep.subr.bf16.mxu1 %v4017_v56 }
 0x387   :  { %2142 = vmatpush1.bf16.msra.mxu0 %v4018_v35  ;;  %2206 = vmatpush1.bf16.msra.mxu1 %v4019_v0 }
 0x388   :  { %2144 = vmatprep.subr.bf16.mxu0 %v4020_v14  ;;  %2208 = vmatprep.subr.bf16.mxu1 %v4021_v20 }
 0x38b   :  { %2146 = vmatpush1.bf16.msra.mxu0 %v4022_v10  ;;  %2210 = vmatpush1.bf16.msra.mxu1 %v4023_v34 }
 0x38c   :  { %2212 = vmatprep.subr.bf16.mxu0 %v4024_v9  ;;  %2276 = vmatprep.subr.bf16.mxu1 %v4025_v42 }
 0x421   :  { %v753_v52 = vpop.f32.mrb[6].mxu0  ;;  %v824_v18 = vpop.f32.mrb[6].mxu1 }
 0x422   :  { %v754_v56 = vadd.f32 %v753_v52, %v4026_v37  ;;  %v755_v27 = vpop.f32.mrb[7].mxu0  ;;  %v826_v35 = vpop.f32.mrb[7].mxu1  ;;  %v825_v34 = vadd.f32 %v824_v18, %v3418_v38 }
 0x423   :  { %v756_v0 = vadd.f32 %v755_v27, %v3411_v2  ;;  %v827_v10 = vadd.f32 %v826_v35, %v3415_v49 }
 0x424   :  { %v1552_v53 = vmul.f32 -1.442695, %v754_v56 }
 0x425   :  { %v1553_v14 = vmul.f32 -1.442695, %v756_v0  ;;  %v1554_v20 = vmul.f32 -1.442695, %v827_v10 }
 0x426   :  { %2643 = vpow2.f32 %v1552_v53 }
 0x427   :  { %2645 = vpow2.f32 %v1553_v14 }
 0x428   :  { %2647 = vpow2.f32 %v1554_v20  ;;  %v4032_v20 = vld [vmem:[#allocation15_spill] sm:$0xff] }
 0x429   :  { %2649 = vtanh.f32 %v825_v34  ;;  %v4030_v34 = vld [vmem:[#allocation12_spill] sm:$0xff] }
 0x430   :  { %v2644_v9 = vpop.eup %2643 }
 0x431   :  { %v2646_v42 = vpop.eup %2645  ;;  %v832_v3 = vadd.f32 1.0, %v2644_v9 }
 0x432   :  { %v838_v11 = vadd.f32 1.0, %v2646_v42  ;;  %v2648_v52 = vpop.eup %2647  ;;  %v4031_v42 = vld [vmem:[#allocation9_spill] sm:$0xff] }
 0x433   :  { %2651 = vrcp.f32 %v832_v3  ;;  %v2650_v37 = vpop.eup %2649  ;;  %v845_v56 = vadd.f32 1.0, %v2648_v52  ;;  %v4028_v3 = vld [vmem:[#allocation11_spill] sm:$0xff]  ;;  %v4033_v52 = vld [vmem:[#allocation10_spill] sm:$0xff] }
 0x434   :  { %2653 = vrcp.f32 %v838_v11  ;;  %v1555_v11 = vld [vmem:[%s3887_s0 + $0x20] sm:$0xff] }
 0x435   :  { %2655 = vrcp.f32 %v845_v56  ;;  %v4035_v56 = vld [vmem:[#allocation13_spill] sm:$0xff] }
 0x43d   :  { %v2652_v27 = vpop.eup %2651 }
 0x43e   :  { %v2654_v0 = vpop.eup %2653  ;;  %v849_v53 = vmul.f32 %v2652_v27, %v2650_v37  ;;  %v4029_v37 = vld [vmem:[#allocation7_spill] sm:$0xff]  ;;  %v4034_v27 = vld [vmem:[#allocation16_spill] sm:$0xff] }
 0x43f   :  { %v848_v14 = vmul.f32 %v2654_v0, %v3574_v21  ;;  %v2656_v10 = vpop.eup %2655  ;;  %v4027_v21 = vld [vmem:[#allocation6_spill] sm:$0xff]  ;;  %v4036_v0 = vld [vmem:[#allocation19_spill] sm:$0xff] }
 0x441   :  { %v3649_v35 = vadd.f32 %v849_v53, %v848_v14  ;;  %v4037_v53 = vld [vmem:[#allocation14_spill] sm:$0xff]  ;;  %v4038_v14 = vld [vmem:[#allocation20_spill] sm:$0xff] }
 0x443   :  { %2657 = vtanh.f32 %v3649_v35 }
 0x44d   :  { %v2658_v18 = vpop.eup %2657 }
 0x44e   :  { %v852_v9 = vmul.f32 %v2658_v18, %v2656_v10  ;;  %v4039_v10 = vld [vmem:[#allocation17_spill] sm:$0xff]  ;;  %v4040_v18 = vld [vmem:[#allocation22_spill] sm:$0xff] }
 0x450   :  { %919 = vmatprep.mubr.f32.mxu0 %v852_v9  ;;  %990 = vmatprep.mubr.f32.mxu1 %v852_v9  ;;  %v4041_v9 = vld [vmem:[#allocation18_spill] sm:$0xff] }
 0x451   :  { %920 = vmatmul.mubr.f32.vlgmr.msra.gmra.mrb[8].mxu0 %v1555_v11  ;;  %991 = vmatmul.mubr.f32.vlgmr.msra.gmra.mrb[8].mxu1 %v1555_v11  ;;  %v4042_v11 = vld [vmem:[#allocation23_spill] sm:$0xff] }
 0x452   :  { %2214 = vmatpush1.bf16.msra.mxu0 %v2778_v7  ;;  %2278 = vmatpush1.bf16.msra.mxu1 %v2827_v24 }
 0x453   :  { %2216 = vmatprep.subr.bf16.mxu0 %v2780_v8  ;;  %2280 = vmatprep.subr.bf16.mxu1 %v2852_v32 }
 0x456   :  { %2218 = vmatpush1.bf16.msra.mxu0 %v2796_v13  ;;  %2282 = vmatpush1.bf16.msra.mxu1 %v2863_v36 }
 0x457   :  { %2220 = vmatprep.subr.bf16.mxu0 %v2805_v16  ;;  %2284 = vmatprep.subr.bf16.mxu1 %v2887_v44 }
 0x45a   :  { %2222 = vmatpush1.bf16.msra.mxu0 %v2830_v25  ;;  %2286 = vmatpush1.bf16.msra.mxu1 %v2896_v47 }
 0x45b   :  { %2224 = vmatprep.subr.bf16.mxu0 %v2843_v29  ;;  %2288 = vmatprep.subr.bf16.mxu1 %v2908_v51 }
 0x45e   :  { %2226 = vmatpush1.bf16.msra.mxu0 %v2879_v41  ;;  %2290 = vmatpush1.bf16.msra.mxu1 %v2938_v61 }
 0x45f   :  { %2228 = vmatprep.subr.bf16.mxu0 %v2890_v45  ;;  %2292 = vmatprep.subr.bf16.mxu1 %v2944_v63 }
 0x462   :  { %2230 = vmatpush1.bf16.msra.mxu0 %v2917_v54  ;;  %2294 = vmatpush1.bf16.msra.mxu1 %v2974_v12 }
 0x463   :  { %2232 = vmatprep.subr.bf16.mxu0 %v2926_v57  ;;  %2296 = vmatprep.subr.bf16.mxu1 %v2980_v15 }
 0x466   :  { %2234 = vmatpush1.bf16.msra.mxu0 %v2959_v5  ;;  %2298 = vmatpush1.bf16.msra.mxu1 %v3010_v30 }
 0x467   :  { %2236 = vmatprep.subr.bf16.mxu0 %v2962_v6  ;;  %2300 = vmatprep.subr.bf16.mxu1 %v3016_v33 }
 0x46a   :  { %2238 = vmatpush1.bf16.msra.mxu0 %v2995_v22  ;;  %2302 = vmatpush1.bf16.msra.mxu1 %v3046_v48 }
 0x46b   :  { %2240 = vmatprep.subr.bf16.mxu0 %v2998_v23  ;;  %2304 = vmatprep.subr.bf16.mxu1 %v3052_v50 }
 0x46e   :  { %2242 = vmatpush1.bf16.msra.mxu0 %v3031_v39  ;;  %2306 = vmatpush1.bf16.msra.mxu1 %v3082_v1 }
 0x46f   :  { %2244 = vmatprep.subr.bf16.mxu0 %v3034_v40  ;;  %2308 = vmatprep.subr.bf16.mxu1 %v3088_v4 }
 0x472   :  { %2246 = vmatpush1.bf16.msra.mxu0 %v3067_v58  ;;  %2310 = vmatpush1.bf16.msra.mxu1 %v3121_v28 }
 0x473   :  { %2248 = vmatprep.subr.bf16.mxu0 %v3070_v59  ;;  %2312 = vmatprep.subr.bf16.mxu1 %v3124_v31 }
 0x476   :  { %2250 = vmatpush1.bf16.msra.mxu0 %v3103_v17  ;;  %2314 = vmatpush1.bf16.msra.mxu1 %v3157_v55 }
 0x477   :  { %2252 = vmatprep.subr.bf16.mxu0 %v3109_v19  ;;  %2316 = vmatprep.subr.bf16.mxu1 %v3163_v60 }
 0x47a   :  { %2254 = vmatpush1.bf16.msra.mxu0 %v3142_v43  ;;  %2318 = vmatpush1.bf16.msra.mxu1 %v3193_v26 }
 0x47b   :  { %2256 = vmatprep.subr.bf16.mxu0 %v3145_v46  ;;  %2320 = vmatprep.subr.bf16.mxu1 %v3957_v62 }
 0x47e   :  { %2258 = vmatpush1.bf16.msra.mxu0 %v4027_v21  ;;  %2322 = vmatpush1.bf16.msra.mxu1 %v4028_v3 }
 0x47f   :  { %2260 = vmatprep.subr.bf16.mxu0 %v4029_v37  ;;  %2324 = vmatprep.subr.bf16.mxu1 %v4030_v34 }
 0x482   :  { %2262 = vmatpush1.bf16.msra.mxu0 %v4031_v42  ;;  %2326 = vmatpush1.bf16.msra.mxu1 %v4032_v20  ;;  %v4043_v20 = vld [vmem:[#allocation21_spill] sm:$0xff]  ;;  %v4047_v42 = vld [vmem:[#allocation8_spill] sm:$0xff] }
 0x483   :  { %2264 = vmatprep.subr.bf16.mxu0 %v4033_v52  ;;  %2328 = vmatprep.subr.bf16.mxu1 %v4034_v27  ;;  %v4044_v52 = vld [vmem:[#allocation24_spill] sm:$0xff] }
 0x484   :  { %v4045_v27 = vld [vmem:[#allocation4_spill] sm:$0xff] }
 0x486   :  { %2266 = vmatpush1.bf16.msra.mxu0 %v4035_v56  ;;  %2330 = vmatpush1.bf16.msra.mxu1 %v4036_v0  ;;  %v4046_v56 = vld [vmem:[#allocation5_spill] sm:$0xff] }
 0x487   :  { %2268 = vmatprep.subr.bf16.mxu0 %v4037_v53  ;;  %2332 = vmatprep.subr.bf16.mxu1 %v4038_v14 }
 0x48a   :  { %2270 = vmatpush1.bf16.msra.mxu0 %v4039_v10  ;;  %2334 = vmatpush1.bf16.msra.mxu1 %v4040_v18 }
 0x48b   :  { %2272 = vmatprep.subr.bf16.mxu0 %v4041_v9  ;;  %2336 = vmatprep.subr.bf16.mxu1 %v4042_v11 }
 0x48e   :  { %2274 = vmatpush1.bf16.msra.mxu0 %v4043_v20  ;;  %2338 = vmatpush1.bf16.msra.mxu1 %v4044_v52 }
 0x48f   :  { %2340 = vmatprep.subr.bf16.mxu0 %v4045_v27  ;;  %2404 = vmatprep.subr.bf16.mxu1 %v4046_v56 }
 0x524   :  { %v921_v0 = vpop.f32.mrb[8].mxu0  ;;  %v992_v53 = vpop.f32.mrb[8].mxu1 }
 0x525   :  { %v922_v14 = vadd.f32 %v921_v0, %v4047_v42  ;;  %v923_v34 = vpop.f32.mrb[9].mxu0  ;;  %v994_v10 = vpop.f32.mrb[9].mxu1  ;;  %v993_v52 = vadd.f32 %v992_v53, %v3418_v38 }
 0x526   :  { %v924_v18 = vadd.f32 %v923_v34, %v3411_v2  ;;  %v995_v20 = vadd.f32 %v994_v10, %v3415_v49 }
 0x527   :  { %v1556_v37 = vmul.f32 -1.442695, %v922_v14 }
 0x528   :  { %v1557_v9 = vmul.f32 -1.442695, %v924_v18  ;;  %v1558_v11 = vmul.f32 -1.442695, %v995_v20 }
 0x529   :  { %2659 = vpow2.f32 %v1556_v37 }
 0x52a   :  { %2661 = vpow2.f32 %v1557_v9 }
 0x52b   :  { %2663 = vpow2.f32 %v1558_v11  ;;  %v4053_v11 = vld [vmem:[#allocation15_spill] sm:$0xff] }
 0x52c   :  { %2665 = vtanh.f32 %v993_v52  ;;  %v4051_v52 = vld [vmem:[#allocation12_spill] sm:$0xff] }
 0x533   :  { %v2660_v27 = vpop.eup %2659 }
 0x534   :  { %v2662_v56 = vpop.eup %2661  ;;  %v1000_v3 = vadd.f32 1.0, %v2660_v27 }
 0x535   :  { %v1006_v21 = vadd.f32 1.0, %v2662_v56  ;;  %v2664_v0 = vpop.eup %2663  ;;  %v4052_v56 = vld [vmem:[#allocation9_spill] sm:$0xff] }
 0x536   :  { %2667 = vrcp.f32 %v1000_v3  ;;  %v2666_v42 = vpop.eup %2665  ;;  %v1013_v14 = vadd.f32 1.0, %v2664_v0  ;;  %v4049_v3 = vld [vmem:[#allocation11_spill] sm:$0xff]  ;;  %v4054_v0 = vld [vmem:[#allocation10_spill] sm:$0xff] }
 0x537   :  { %2669 = vrcp.f32 %v1006_v21  ;;  %v1559_v21 = vld [vmem:[%s3887_s0 + $0x28] sm:$0xff] }
 0x538   :  { %2671 = vrcp.f32 %v1013_v14  ;;  %v4056_v14 = vld [vmem:[#allocation13_spill] sm:$0xff] }
 0x540   :  { %v2668_v34 = vpop.eup %2667 }
 0x541   :  { %v2670_v18 = vpop.eup %2669  ;;  %v1017_v37 = vmul.f32 %v2668_v34, %v2666_v42  ;;  %v4050_v42 = vld [vmem:[#allocation7_spill] sm:$0xff]  ;;  %v4055_v34 = vld [vmem:[#allocation16_spill] sm:$0xff] }
 0x542   :  { %v1016_v9 = vmul.f32 %v2670_v18, %v3649_v35  ;;  %v2672_v20 = vpop.eup %2671  ;;  %v4048_v35 = vld [vmem:[#allocation6_spill] sm:$0xff]  ;;  %v4057_v18 = vld [vmem:[#allocation19_spill] sm:$0xff] }
 0x544   :  { %v3724_v10 = vadd.f32 %v1017_v37, %v1016_v9  ;;  %v4058_v37 = vld [vmem:[#allocation14_spill] sm:$0xff]  ;;  %v4059_v9 = vld [vmem:[#allocation20_spill] sm:$0xff] }
 0x546   :  { %2673 = vtanh.f32 %v3724_v10 }
 0x550   :  { %v2674_v53 = vpop.eup %2673 }
 0x551   :  { %v1020_v27 = vmul.f32 %v2674_v53, %v2672_v20  ;;  %v4060_v20 = vld [vmem:[#allocation17_spill] sm:$0xff]  ;;  %v4061_v53 = vld [vmem:[#allocation22_spill] sm:$0xff] }
 0x553   :  { %1087 = vmatprep.mubr.f32.mxu0 %v1020_v27  ;;  %1158 = vmatprep.mubr.f32.mxu1 %v1020_v27  ;;  %v4062_v27 = vld [vmem:[#allocation18_spill] sm:$0xff] }
 0x554   :  { %1088 = vmatmul.mubr.f32.vlgmr.msra.gmra.mrb[10].mxu0 %v1559_v21  ;;  %1159 = vmatmul.mubr.f32.vlgmr.msra.gmra.mrb[10].mxu1 %v1559_v21  ;;  %v4063_v21 = vld [vmem:[#allocation23_spill] sm:$0xff] }
 0x555   :  { %2342 = vmatpush1.bf16.msra.mxu0 %v2778_v7  ;;  %2406 = vmatpush1.bf16.msra.mxu1 %v2827_v24 }
 0x556   :  { %2344 = vmatprep.subr.bf16.mxu0 %v2780_v8  ;;  %2408 = vmatprep.subr.bf16.mxu1 %v2852_v32 }
 0x559   :  { %2346 = vmatpush1.bf16.msra.mxu0 %v2796_v13  ;;  %2410 = vmatpush1.bf16.msra.mxu1 %v2863_v36 }
 0x55a   :  { %2348 = vmatprep.subr.bf16.mxu0 %v2805_v16  ;;  %2412 = vmatprep.subr.bf16.mxu1 %v2887_v44 }
 0x55d   :  { %2350 = vmatpush1.bf16.msra.mxu0 %v2830_v25  ;;  %2414 = vmatpush1.bf16.msra.mxu1 %v2896_v47 }
 0x55e   :  { %2352 = vmatprep.subr.bf16.mxu0 %v2843_v29  ;;  %2416 = vmatprep.subr.bf16.mxu1 %v2908_v51 }
 0x561   :  { %2354 = vmatpush1.bf16.msra.mxu0 %v2879_v41  ;;  %2418 = vmatpush1.bf16.msra.mxu1 %v2938_v61 }
 0x562   :  { %2356 = vmatprep.subr.bf16.mxu0 %v2890_v45  ;;  %2420 = vmatprep.subr.bf16.mxu1 %v2944_v63 }
 0x565   :  { %2358 = vmatpush1.bf16.msra.mxu0 %v2917_v54  ;;  %2422 = vmatpush1.bf16.msra.mxu1 %v2974_v12 }
 0x566   :  { %2360 = vmatprep.subr.bf16.mxu0 %v2926_v57  ;;  %2424 = vmatprep.subr.bf16.mxu1 %v2980_v15 }
 0x569   :  { %2362 = vmatpush1.bf16.msra.mxu0 %v2959_v5  ;;  %2426 = vmatpush1.bf16.msra.mxu1 %v3010_v30 }
 0x56a   :  { %2364 = vmatprep.subr.bf16.mxu0 %v2962_v6  ;;  %2428 = vmatprep.subr.bf16.mxu1 %v3016_v33 }
 0x56d   :  { %2366 = vmatpush1.bf16.msra.mxu0 %v2995_v22  ;;  %2430 = vmatpush1.bf16.msra.mxu1 %v3046_v48 }
 0x56e   :  { %2368 = vmatprep.subr.bf16.mxu0 %v2998_v23  ;;  %2432 = vmatprep.subr.bf16.mxu1 %v3052_v50 }
 0x571   :  { %2370 = vmatpush1.bf16.msra.mxu0 %v3031_v39  ;;  %2434 = vmatpush1.bf16.msra.mxu1 %v3082_v1 }
 0x572   :  { %2372 = vmatprep.subr.bf16.mxu0 %v3034_v40  ;;  %2436 = vmatprep.subr.bf16.mxu1 %v3088_v4 }
 0x575   :  { %2374 = vmatpush1.bf16.msra.mxu0 %v3067_v58  ;;  %2438 = vmatpush1.bf16.msra.mxu1 %v3121_v28 }
 0x576   :  { %2376 = vmatprep.subr.bf16.mxu0 %v3070_v59  ;;  %2440 = vmatprep.subr.bf16.mxu1 %v3124_v31 }
 0x579   :  { %2378 = vmatpush1.bf16.msra.mxu0 %v3103_v17  ;;  %2442 = vmatpush1.bf16.msra.mxu1 %v3157_v55 }
 0x57a   :  { %2380 = vmatprep.subr.bf16.mxu0 %v3109_v19  ;;  %2444 = vmatprep.subr.bf16.mxu1 %v3163_v60 }
 0x57d   :  { %2382 = vmatpush1.bf16.msra.mxu0 %v3142_v43  ;;  %2446 = vmatpush1.bf16.msra.mxu1 %v3193_v26 }
 0x57e   :  { %2384 = vmatprep.subr.bf16.mxu0 %v3145_v46  ;;  %2448 = vmatprep.subr.bf16.mxu1 %v3957_v62 }
 0x581   :  { %2386 = vmatpush1.bf16.msra.mxu0 %v4048_v35  ;;  %2450 = vmatpush1.bf16.msra.mxu1 %v4049_v3 }
 0x582   :  { %2388 = vmatprep.subr.bf16.mxu0 %v4050_v42  ;;  %2452 = vmatprep.subr.bf16.mxu1 %v4051_v52 }
 0x585   :  { %2390 = vmatpush1.bf16.msra.mxu0 %v4052_v56  ;;  %2454 = vmatpush1.bf16.msra.mxu1 %v4053_v11  ;;  %v4064_v11 = vld [vmem:[#allocation21_spill] sm:$0xff]  ;;  %v4068_v56 = vld [vmem:[#allocation8_spill] sm:$0xff] }
 0x586   :  { %2392 = vmatprep.subr.bf16.mxu0 %v4054_v0  ;;  %2456 = vmatprep.subr.bf16.mxu1 %v4055_v34  ;;  %v4065_v0 = vld [vmem:[#allocation24_spill] sm:$0xff] }
 0x587   :  { %v4066_v34 = vld [vmem:[#allocation4_spill] sm:$0xff] }
 0x589   :  { %2394 = vmatpush1.bf16.msra.mxu0 %v4056_v14  ;;  %2458 = vmatpush1.bf16.msra.mxu1 %v4057_v18  ;;  %v4067_v14 = vld [vmem:[#allocation5_spill] sm:$0xff] }
 0x58a   :  { %2396 = vmatprep.subr.bf16.mxu0 %v4058_v37  ;;  %2460 = vmatprep.subr.bf16.mxu1 %v4059_v9 }
 0x58d   :  { %2398 = vmatpush1.bf16.msra.mxu0 %v4060_v20  ;;  %2462 = vmatpush1.bf16.msra.mxu1 %v4061_v53 }
 0x58e   :  { %2400 = vmatprep.subr.bf16.mxu0 %v4062_v27  ;;  %2464 = vmatprep.subr.bf16.mxu1 %v4063_v21 }
 0x591   :  { %2402 = vmatpush1.bf16.msra.mxu0 %v4064_v11  ;;  %2466 = vmatpush1.bf16.msra.mxu1 %v4065_v0 }
 0x592   :  { %2468 = vmatprep.subr.bf16.mxu0 %v4066_v34  ;;  %2532 = vmatprep.subr.bf16.mxu1 %v4067_v14 }
 0x627   :  { %v1089_v18 = vpop.f32.mrb[10].mxu0  ;;  %v1160_v37 = vpop.f32.mrb[10].mxu1 }
 0x628   :  { %v1090_v9 = vadd.f32 %v1089_v18, %v4068_v56  ;;  %v1091_v52 = vpop.f32.mrb[11].mxu0  ;;  %v1162_v20 = vpop.f32.mrb[11].mxu1  ;;  %v1161_v0 = vadd.f32 %v1160_v37, %v3418_v38 }
 0x629   :  { %v1092_v53 = vadd.f32 %v1091_v52, %v3411_v2  ;;  %v1163_v11 = vadd.f32 %v1162_v20, %v3415_v49 }
 0x62a   :  { %v1560_v42 = vmul.f32 -1.442695, %v1090_v9 }
 0x62b   :  { %v1561_v27 = vmul.f32 -1.442695, %v1092_v53  ;;  %v1562_v21 = vmul.f32 -1.442695, %v1163_v11 }
 0x62c   :  { %2675 = vpow2.f32 %v1560_v42 }
 0x62d   :  { %2677 = vpow2.f32 %v1561_v27 }
 0x62e   :  { %2679 = vpow2.f32 %v1562_v21 }
 0x62f   :  { %2681 = vtanh.f32 %v1161_v0 }
 0x636   :  { %v2676_v34 = vpop.eup %2675 }
 0x637   :  { %v2678_v14 = vpop.eup %2677  ;;  %v1168_v3 = vadd.f32 1.0, %v2676_v34 }
 0x638   :  { %v1174_v35 = vadd.f32 1.0, %v2678_v14  ;;  %v2680_v18 = vpop.eup %2679 }
 0x639   :  { %2683 = vrcp.f32 %v1168_v3  ;;  %v2682_v56 = vpop.eup %2681  ;;  %v1181_v9 = vadd.f32 1.0, %v2680_v18  ;;  %v1567_v3 = vld [vmem:[%s3887_s0 + $0x38] sm:$0xff] }
 0x63a   :  { %2685 = vrcp.f32 %v1174_v35  ;;  %v1563_v35 = vld [vmem:[%s3887_s0 + $0x30] sm:$0xff] }
 0x63b   :  { %2687 = vrcp.f32 %v1181_v9 }
 0x643   :  { %v2684_v52 = vpop.eup %2683 }
 0x644   :  { %v2686_v53 = vpop.eup %2685  ;;  %v1185_v42 = vmul.f32 %v2684_v52, %v2682_v56 }
 0x645   :  { %v1184_v27 = vmul.f32 %v2686_v53, %v3724_v10  ;;  %v2688_v11 = vpop.eup %2687 }
 0x647   :  { %v3799_v20 = vadd.f32 %v1185_v42, %v1184_v27 }
 0x649   :  { %2689 = vtanh.f32 %v3799_v20 }
 0x653   :  { %v2690_v37 = vpop.eup %2689 }
 0x654   :  { %v1188_v21 = vmul.f32 %v2690_v37, %v2688_v11 }
 0x656   :  { %1255 = vmatprep.mubr.f32.mxu0 %v1188_v21  ;;  %1326 = vmatprep.mubr.f32.mxu1 %v1188_v21 }
 0x657   :  { %1256 = vmatmul.mubr.f32.vlgmr.msra.gmra.mrb[12].mxu0 %v1563_v35  ;;  %1327 = vmatmul.mubr.f32.vlgmr.msra.gmra.mrb[12].mxu1 %v1563_v35 }
 0x658   :  { %2470 = vmatpush1.bf16.msra.mxu0 %v2778_v7  ;;  %2534 = vmatpush1.bf16.msra.mxu1 %v2827_v24  ;;  %v4069_v7 = vld [vmem:[#allocation6_spill] sm:$0xff]  ;;  %v4073_v24 = vld [vmem:[#allocation9_spill] sm:$0xff] }
 0x659   :  { %2472 = vmatprep.subr.bf16.mxu0 %v2780_v8  ;;  %2536 = vmatprep.subr.bf16.mxu1 %v2852_v32  ;;  %v4070_v8 = vld [vmem:[#allocation11_spill] sm:$0xff]  ;;  %v4076_v32 = vld [vmem:[#allocation16_spill] sm:$0xff] }
 0x65c   :  { %2474 = vmatpush1.bf16.msra.mxu0 %v2796_v13  ;;  %2538 = vmatpush1.bf16.msra.mxu1 %v2863_v36  ;;  %v4071_v13 = vld [vmem:[#allocation7_spill] sm:$0xff]  ;;  %v4077_v36 = vld [vmem:[#allocation13_spill] sm:$0xff] }
 0x65d   :  { %2476 = vmatprep.subr.bf16.mxu0 %v2805_v16  ;;  %2540 = vmatprep.subr.bf16.mxu1 %v2887_v44  ;;  %v4072_v16 = vld [vmem:[#allocation12_spill] sm:$0xff]  ;;  %v4079_v44 = vld [vmem:[#allocation14_spill] sm:$0xff] }
 0x660   :  { %2478 = vmatpush1.bf16.msra.mxu0 %v2830_v25  ;;  %2542 = vmatpush1.bf16.msra.mxu1 %v2896_v47  ;;  %v4074_v25 = vld [vmem:[#allocation15_spill] sm:$0xff]  ;;  %v4081_v47 = vld [vmem:[#allocation17_spill] sm:$0xff] }
 0x661   :  { %2480 = vmatprep.subr.bf16.mxu0 %v2843_v29  ;;  %2544 = vmatprep.subr.bf16.mxu1 %v2908_v51  ;;  %v4075_v29 = vld [vmem:[#allocation10_spill] sm:$0xff] }
 0x662   :  { %v4082_v51 = vld [vmem:[#allocation22_spill] sm:$0xff] }
 0x664   :  { %2482 = vmatpush1.bf16.msra.mxu0 %v2879_v41  ;;  %2546 = vmatpush1.bf16.msra.mxu1 %v2938_v61  ;;  %v4078_v41 = vld [vmem:[#allocation19_spill] sm:$0xff]  ;;  %v4085_v61 = vld [vmem:[#allocation21_spill] sm:$0xff] }
 0x665   :  { %2484 = vmatprep.subr.bf16.mxu0 %v2890_v45  ;;  %2548 = vmatprep.subr.bf16.mxu1 %v2944_v63  ;;  %v4080_v45 = vld [vmem:[#allocation20_spill] sm:$0xff] }
 0x666   :  { %v4086_v63 = vld [vmem:[#allocation24_spill] sm:$0xff] }
 0x668   :  { %2486 = vmatpush1.bf16.msra.mxu0 %v2917_v54  ;;  %2550 = vmatpush1.bf16.msra.mxu1 %v2974_v12  ;;  %v4083_v54 = vld [vmem:[#allocation18_spill] sm:$0xff]  ;;  %v4087_v12 = vld [vmem:[#allocation8_spill] sm:$0xff] }
 0x669   :  { %2488 = vmatprep.subr.bf16.mxu0 %v2926_v57  ;;  %2552 = vmatprep.subr.bf16.mxu1 %v2980_v15  ;;  %v4084_v57 = vld [vmem:[#allocation23_spill] sm:$0xff] }
 0x66c   :  { %2490 = vmatpush1.bf16.msra.mxu0 %v2959_v5  ;;  %2554 = vmatpush1.bf16.msra.mxu1 %v3010_v30 }
 0x66d   :  { %2492 = vmatprep.subr.bf16.mxu0 %v2962_v6  ;;  %2556 = vmatprep.subr.bf16.mxu1 %v3016_v33 }
 0x670   :  { %2494 = vmatpush1.bf16.msra.mxu0 %v2995_v22  ;;  %2558 = vmatpush1.bf16.msra.mxu1 %v3046_v48 }
 0x671   :  { %2496 = vmatprep.subr.bf16.mxu0 %v2998_v23  ;;  %2560 = vmatprep.subr.bf16.mxu1 %v3052_v50 }
 0x674   :  { %2498 = vmatpush1.bf16.msra.mxu0 %v3031_v39  ;;  %2562 = vmatpush1.bf16.msra.mxu1 %v3082_v1 }
 0x675   :  { %2500 = vmatprep.subr.bf16.mxu0 %v3034_v40  ;;  %2564 = vmatprep.subr.bf16.mxu1 %v3088_v4 }
 0x678   :  { %2502 = vmatpush1.bf16.msra.mxu0 %v3067_v58  ;;  %2566 = vmatpush1.bf16.msra.mxu1 %v3121_v28 }
 0x679   :  { %2504 = vmatprep.subr.bf16.mxu0 %v3070_v59  ;;  %2568 = vmatprep.subr.bf16.mxu1 %v3124_v31 }
 0x67c   :  { %2506 = vmatpush1.bf16.msra.mxu0 %v3103_v17  ;;  %2570 = vmatpush1.bf16.msra.mxu1 %v3157_v55 }
 0x67d   :  { %2508 = vmatprep.subr.bf16.mxu0 %v3109_v19  ;;  %2572 = vmatprep.subr.bf16.mxu1 %v3163_v60 }
 0x680   :  { %2510 = vmatpush1.bf16.msra.mxu0 %v3142_v43  ;;  %2574 = vmatpush1.bf16.msra.mxu1 %v3193_v26 }
 0x681   :  { %2512 = vmatprep.subr.bf16.mxu0 %v3145_v46  ;;  %2576 = vmatprep.subr.bf16.mxu1 %v3957_v62 }
 0x684   :  { %2514 = vmatpush1.bf16.msra.mxu0 %v4069_v7  ;;  %2578 = vmatpush1.bf16.msra.mxu1 %v4070_v8 }
 0x685   :  { %2516 = vmatprep.subr.bf16.mxu0 %v4071_v13  ;;  %2580 = vmatprep.subr.bf16.mxu1 %v4072_v16 }
 0x688   :  { %2518 = vmatpush1.bf16.msra.mxu0 %v4073_v24  ;;  %2582 = vmatpush1.bf16.msra.mxu1 %v4074_v25 }
 0x689   :  { %2520 = vmatprep.subr.bf16.mxu0 %v4075_v29  ;;  %2584 = vmatprep.subr.bf16.mxu1 %v4076_v32 }
 0x68c   :  { %2522 = vmatpush1.bf16.msra.mxu0 %v4077_v36  ;;  %2586 = vmatpush1.bf16.msra.mxu1 %v4078_v41 }
 0x68d   :  { %2524 = vmatprep.subr.bf16.mxu0 %v4079_v44  ;;  %2588 = vmatprep.subr.bf16.mxu1 %v4080_v45 }
 0x690   :  { %2526 = vmatpush1.bf16.msra.mxu0 %v4081_v47  ;;  %2590 = vmatpush1.bf16.msra.mxu1 %v4082_v51 }
 0x691   :  { %2528 = vmatprep.subr.bf16.mxu0 %v4083_v54  ;;  %2592 = vmatprep.subr.bf16.mxu1 %v4084_v57 }
 0x694   :  { %2530 = vmatpush1.bf16.msra.mxu0 %v4085_v61  ;;  %2594 = vmatpush1.bf16.msra.mxu1 %v4086_v63 }
 0x72a   :  { %v1257_v5 = vpop.f32.mrb[12].mxu0  ;;  %v1328_v6 = vpop.f32.mrb[12].mxu1 }
 0x72b   :  { %v1258_v15 = vadd.f32 %v1257_v5, %v4087_v12  ;;  %v1259_v22 = vpop.f32.mrb[13].mxu0  ;;  %v1330_v23 = vpop.f32.mrb[13].mxu1  ;;  %v1329_v50 = vadd.f32 %v1328_v6, %v3418_v38 }
 0x72c   :  { %v1260_v30 = vadd.f32 %v1259_v22, %v3411_v2  ;;  %v1331_v40 = vadd.f32 %v1330_v23, %v3415_v49 }
 0x72d   :  { %v1564_v33 = vmul.f32 -1.442695, %v1258_v15 }
 0x72e   :  { %v1565_v39 = vmul.f32 -1.442695, %v1260_v30  ;;  %v1566_v48 = vmul.f32 -1.442695, %v1331_v40 }
 0x72f   :  { %2691 = vpow2.f32 %v1564_v33 }
 0x730   :  { %2693 = vpow2.f32 %v1565_v39 }
 0x731   :  { %2695 = vpow2.f32 %v1566_v48 }
 0x732   :  { %2697 = vtanh.f32 %v1329_v50 }
 0x739   :  { %v2692_v58 = vpop.eup %2691 }
 0x73a   :  { %v2694_v59 = vpop.eup %2693  ;;  %v1336_v1 = vadd.f32 1.0, %v2692_v58 }
 0x73b   :  { %v1342_v4 = vadd.f32 1.0, %v2694_v59  ;;  %v2696_v17 = vpop.eup %2695 }
 0x73c   :  { %2699 = vrcp.f32 %v1336_v1  ;;  %v2698_v19 = vpop.eup %2697  ;;  %v1349_v31 = vadd.f32 1.0, %v2696_v17 }
 0x73d   :  { %2701 = vrcp.f32 %v1342_v4 }
 0x73e   :  { %2703 = vrcp.f32 %v1349_v31 }
 0x746   :  { %v2700_v28 = vpop.eup %2699 }
 0x747   :  { %v2702_v43 = vpop.eup %2701  ;;  %v1353_v46 = vmul.f32 %v2700_v28, %v2698_v19 }
 0x748   :  { %v1352_v55 = vmul.f32 %v2702_v43, %v3799_v20  ;;  %v2704_v26 = vpop.eup %2703 }
 0x74a   :  { %v1354_v60 = vadd.f32 %v1353_v46, %v1352_v55 }
 0x74c   :  { %2705 = vtanh.f32 %v1354_v60 }
 0x756   :  { %v2706_v62 = vpop.eup %2705 }
 0x757   :  { %v1356_v10 = vmul.f32 %v2706_v62, %v2704_v26 }
 0x759   :  { %1423 = vmatprep.mubr.f32.mxu0 %v1356_v10  ;;  %1494 = vmatprep.mubr.f32.mxu1 %v1356_v10 }
 0x75a   :  { %1424 = vmatmul.mubr.f32.vlgmr.msra.gmra.mrb[14].mxu0 %v1567_v3  ;;  %1495 = vmatmul.mubr.f32.vlgmr.msra.gmra.mrb[14].mxu1 %v1567_v3 }
 0x82d   :  { %v1425_v56 = vpop.f32.mrb[14].mxu0  ;;  %v1496_v0 = vpop.f32.mrb[14].mxu1 }
 0x82e   :  { %v1426_v34 = vadd.f32 %v1425_v56, %v4087_v12  ;;  %v1427_v14 = vpop.f32.mrb[15].mxu0  ;;  %v1498_v18 = vpop.f32.mrb[15].mxu1  ;;  %v1497_v20 = vadd.f32 %v1496_v0, %v3418_v38 }
 0x82f   :  { %v1428_v52 = vadd.f32 %v1427_v14, %v3411_v2  ;;  %v1499_v42 = vadd.f32 %v1498_v18, %v3415_v49 }
 0x830   :  { %v1568_v9 = vmul.f32 -1.442695, %v1426_v34 }
 0x831   :  { %v1569_v53 = vmul.f32 -1.442695, %v1428_v52  ;;  %v1570_v27 = vmul.f32 -1.442695, %v1499_v42 }
 0x832   :  { %2707 = vpow2.f32 %v1568_v9 }
 0x833   :  { %2709 = vpow2.f32 %v1569_v53 }
 0x834   :  { %2711 = vpow2.f32 %v1570_v27 }
 0x835   :  { %2713 = vtanh.f32 %v1497_v20 }
 0x83c   :  { %v2708_v11 = vpop.eup %2707 }
 0x83d   :  { %v2710_v37 = vpop.eup %2709  ;;  %v1504_v21 = vadd.f32 1.0, %v2708_v11 }
 0x83e   :  { %v1510_v35 = vadd.f32 1.0, %v2710_v37  ;;  %v2712_v7 = vpop.eup %2711 }
 0x83f   :  { %2715 = vrcp.f32 %v1504_v21  ;;  %v2714_v8 = vpop.eup %2713  ;;  %v1517_v13 = vadd.f32 1.0, %v2712_v7 }
 0x840   :  { %2717 = vrcp.f32 %v1510_v35 }
 0x841   :  { %2719 = vrcp.f32 %v1517_v13 }
 0x849   :  { %v2716_v2 = vpop.eup %2715 }
 0x84a   :  { %v2718_v16 = vpop.eup %2717  ;;  %v1521_v24 = vmul.f32 %v2716_v2, %v2714_v8 }
 0x84b   :  { %v1520_v25 = vmul.f32 %v2718_v16, %v1354_v60  ;;  %v2720_v49 = vpop.eup %2719 }
 0x84d   :  { %v1522_v29 = vadd.f32 %v1521_v24, %v1520_v25 }
 0x84f   :  { %2721 = vtanh.f32 %v1522_v29  ;;  %1531 = vst [vmem:[%s3890_s6] sm:$0xff] %v1522_v29 }
 0x859   :  { %v2722_v38 = vpop.eup %2721 }
 0x85a   :  { %v1524_v32 = vmul.f32 %v2722_v38, %v2720_v49 }
 0x85c   :  { %1530 = vst [vmem:[%s3891_s5] sm:$0xff] %v1524_v32 }

</bundles_post_ra>
